<compile_context>
chip_gen: v5e
topology: v5e:2x2
jax: 0.10.0
libtpu: 0.0.40
codegen_flags: <defaults>
</compile_context>

<pallas_src>
import functools

import jax
import jax.numpy as jnp
from jax import lax
from jax.experimental import pallas as pl
from jax.experimental.pallas import tpu as pltpu


# ------------------------------ fused kernel --------------------------------

def _fused_inverted_residual_kernel(
        x_ref,            # (H, W, Cin)     whole image (re-DMA elided across strips)
        w1_ref,           # (Cin, Cmid)     expand weight, BN1 scale folded (compute dtype)
        b1_ref,           # (1, Cmid)       BN1 bias (f32)
        wd_ref,           # (3, 3, Cmid)    depthwise weight, BN2 scale folded (f32)
        bd_ref,           # (1, 1, Cmid)    BN2 bias (f32)
        w3_ref,           # (Cmid, Cout)    project weight, BN3 scale folded (compute dtype)
        b3_ref,           # (1, Cout)       BN3 bias (f32)
        o_ref,            # (strip_oh, Wo, Cout) output strip
        h1_ref,           # VMEM scratch (strip_ih, W + 2*dilate, Cmid), compute dtype
        *, stride, dilate, strip_oh, h, w, wo, use_res, compute_dtype):
    s = pl.program_id(1)
    strip_ih = (strip_oh - 1) * stride + 2 * dilate + 1
    mid_rows = strip_ih - 2 * dilate              # rows always inside the image
    r0 = s * (strip_oh * stride) - dilate         # image row of h1 row 0
    cmid = h1_ref.shape[-1]

    w1 = w1_ref[...]
    b1 = b1_ref[...].astype(jnp.float32)

    # Depthwise zero padding (columns) lives in VMEM: zero only the halo column
    # slivers; every h1 row/interior column is rewritten below.
    if dilate > 0:
        sliver = jnp.zeros((strip_ih, dilate, cmid), h1_ref.dtype)
        h1_ref[:, :dilate, :] = sliver
        h1_ref[:, dilate + w:, :] = sliver

    # ---- stage 1: 1x1 expand (+ folded BN1) + ReLU6 --------------------------
    # (a) one big matmul for the rows that are in-bounds for every strip.
    row_start = s * (strip_oh * stride)
    if (strip_oh * stride) % 8 == 0:
        row_start = pl.multiple_of(row_start, 8)
    xmid = x_ref[pl.ds(row_start, mid_rows), :, :]            # (mid_rows, W, Cin)
    xmid2 = xmid.reshape(mid_rows * w, -1).astype(compute_dtype)
    y = jnp.dot(xmid2, w1, preferred_element_type=jnp.float32)
    y = jnp.clip(y + b1, 0.0, 6.0)
    h1_ref[dilate:dilate + mid_rows, dilate:dilate + w, :] = (
        y.reshape(mid_rows, w, -1).astype(h1_ref.dtype))

    # (b) the 2*dilate edge rows of the window: clamped per-row dot, masked so
    #     out-of-image rows are exact zeros (the conv's zero padding is applied
    #     to the *expanded* activation, not to the raw input).
    for i in list(range(dilate)) + list(range(strip_ih - dilate, strip_ih)):
        r = r0 + i
        validf = jnp.logical_and(r >= 0, r < h).astype(jnp.float32)
        rc = jnp.clip(r, 0, h - 1)
        xrow = x_ref[rc, :, :].astype(compute_dtype)            # (W, Cin)
        yr = jnp.dot(xrow, w1, preferred_element_type=jnp.float32)
        yr = jnp.clip(yr + b1, 0.0, 6.0) * validf
        h1_ref[i, dilate:dilate + w, :] = yr.astype(h1_ref.dtype)

    # ---- stage 2: 3x3 depthwise (+ folded BN2) + ReLU6 -----------------------
    # Register-accumulated (no VMEM accumulator round trips).
    acc = None
    for kh in range(3):
        for kw in range(3):
            ro, co = kh * dilate, kw * dilate
            if stride == 1:
                patch = h1_ref[ro:ro + strip_oh, co:co + wo, :]
            else:
                # TODO(synk): de-interleave h1 by column parity once per strip so
                # the taps read contiguously instead of 9 sublane-strided loads.
                patch = h1_ref[pl.ds(ro, strip_oh, stride=stride),
                               pl.ds(co, wo, stride=stride), :]
            tap = wd_ref[kh:kh + 1, kw:kw + 1, :]               # (1, 1, Cmid) f32
            contrib = patch.astype(jnp.float32) * tap
            acc = contrib if acc is None else acc + contrib
    h2 = jnp.clip(acc + bd_ref[...], 0.0, 6.0)                  # (strip_oh, Wo, Cmid)

    # ---- stage 3: 1x1 project (+ folded BN3) (+ residual) --------------------
    y3 = jnp.dot(h2.reshape(strip_oh * wo, cmid).astype(compute_dtype),
                 w3_ref[...], preferred_element_type=jnp.float32)
    y3 = y3 + b3_ref[...].astype(jnp.float32)
    y3 = y3.reshape(strip_oh, wo, -1)
    if use_res:
        # use_res guarantees stride == 1, so Wo == W and Cin == Cout; the add is
        # done on the 3-D view (no reshape of the residual slice).
        row0 = s * strip_oh
        if strip_oh % 8 == 0:
            row0 = pl.multiple_of(row0, 8)
        res = x_ref[pl.ds(row0, strip_oh), :, :]                # (strip_oh, W, Cin)
        y3 = y3 + res.astype(jnp.float32)
    o_ref[...] = y3.astype(o_ref.dtype)


# --------------------------------- wrapper -----------------------------------

def _round_up(v, m):
    return ((v + m - 1) // m) * m


def _largest_divisor_at_most(n, target):
    target = max(1, min(n, target))
    for d in range(target, 0, -1):
        if n % d == 0:
            return d
    return 1


def _vmem_estimate(strip_oh, *, stride, dilate, h, w, wo, cin, cmid, cout, cbytes):
    strip_ih = (strip_oh - 1) * stride + 2 * dilate + 1
    wp = w + 2 * dilate
    h1 = strip_ih * _round_up(wp, 8) * _round_up(cmid, 128) * cbytes
    xb = 2 * h * _round_up(w, 8) * _round_up(cin, 128) * 4          # double buffered
    ob = 2 * strip_oh * _round_up(wo, 8) * _round_up(cout, 128) * 4
    wt = 2 * (_round_up(cin, 8) * _round_up(cmid, 128) * cbytes
              + _round_up(cmid, 8) * _round_up(cout, 128) * cbytes
              + 6 * 8 * _round_up(cmid, 128) * 4
              + 8 * _round_up(cout, 128) * 4)
    return h1 + xb + ob + wt + (2 << 20)                            # + margin


def inverted_residual_forward(x_nchw, params, *, stride, dilate,
                              max_strip_rows=32, use_bf16=True):
    """x_nchw: (N, Cin, H, W) -> (N, Cout, Ho, Wo). Single fused Pallas call."""
    assert stride in (1, 2)
    assert dilate >= 1
    compute_dtype = jnp.bfloat16 if use_bf16 else jnp.float32
    cbytes = jnp.dtype(compute_dtype).itemsize

    x = jnp.transpose(x_nchw, (0, 2, 3, 1))                         # NHWC
    n, h, w, cin = x.shape
    cmid = params["w1"].shape[1]
    cout = params["w3"].shape[1]
    ho = (h - 1) // stride + 1
    wo = (w - 1) // stride + 1
    use_res = (stride == 1) and (cin == cout)

    # Fold BN scales into the conv weights (eps already folded into s*); only
    # the biases stay in-kernel.  MXU operands optionally cast to bf16.
    w1 = (params["w1"] * params["s1"][None, :]).astype(compute_dtype)
    wd = (params["wd"] * params["sd"][None, None, :]).astype(jnp.float32)
    w3 = (params["w3"] * params["s3"][None, :]).astype(compute_dtype)
    b1 = params["b1"].reshape(1, cmid).astype(jnp.float32)
    bd = params["bd"].reshape(1, 1, cmid).astype(jnp.float32)
    b3 = params["b3"].reshape(1, cout).astype(jnp.float32)

    # Strip sizing: largest exact divisor of Ho <= max_strip_rows whose VMEM
    # footprint (with (8,128) padding) fits a conservative budget.
    budget = 24 * 1024 * 1024
    strip_oh = _largest_divisor_at_most(ho, max_strip_rows)
    while strip_oh > 1 and _vmem_estimate(
            strip_oh, stride=stride, dilate=dilate, h=h, w=w, wo=wo,
            cin=cin, cmid=cmid, cout=cout, cbytes=cbytes) > budget:
        strip_oh = _largest_divisor_at_most(ho, strip_oh - 1)
    n_strips = ho // strip_oh
    strip_ih = (strip_oh - 1) * stride + 2 * dilate + 1
    wp = w + 2 * dilate

    est = _vmem_estimate(strip_oh, stride=stride, dilate=dilate, h=h, w=w,
                         wo=wo, cin=cin, cmid=cmid, cout=cout, cbytes=cbytes)
    vmem_limit = int(min(56 * 1024 * 1024, max(32 * 1024 * 1024, 2 * est)))

    kernel = functools.partial(
        _fused_inverted_residual_kernel,
        stride=stride, dilate=dilate, strip_oh=strip_oh,
        h=h, w=w, wo=wo, use_res=use_res, compute_dtype=compute_dtype)

    out = pl.pallas_call(
        kernel,
        out_shape=jax.ShapeDtypeStruct((n, ho, wo, cout), x.dtype),
        grid=(n, n_strips),
        in_specs=[
            pl.BlockSpec((None, h, w, cin), lambda b, s: (b, 0, 0, 0)),
            pl.BlockSpec((cin, cmid), lambda b, s: (0, 0)),
            pl.BlockSpec((1, cmid), lambda b, s: (0, 0)),
            pl.BlockSpec((3, 3, cmid), lambda b, s: (0, 0, 0)),
            pl.BlockSpec((1, 1, cmid), lambda b, s: (0, 0, 0)),
            pl.BlockSpec((cmid, cout), lambda b, s: (0, 0)),
            pl.BlockSpec((1, cout), lambda b, s: (0, 0)),
        ],
        out_specs=pl.BlockSpec((None, strip_oh, wo, cout),
                               lambda b, s: (b, s, 0, 0)),
        scratch_shapes=[
            pltpu.VMEM((strip_ih, wp, cmid), compute_dtype),
        ],
        compiler_params=pltpu.CompilerParams(
            dimension_semantics=("parallel", "parallel"),
            vmem_limit_bytes=vmem_limit),
    )(x, w1, b1, wd, bd, w3, b3)

    return jnp.transpose(out, (0, 3, 1, 2))                         # back to NCHW


# ----------------------- parameter setup & reference -------------------------

def _fold_bn(gamma, beta, mean, var, eps=1e-5):
    scale = gamma / jnp.sqrt(var + eps)
    bias = beta - mean * scale
    return scale, bias


def make_params(key, inp, oup, expand_ratio):
    cmid = inp * expand_ratio
    ks = jax.random.split(key, 16)
    f32 = jnp.float32

    w1 = 0.1 * jax.random.normal(ks[0], (inp, cmid), f32)      # 1x1 expand (Cin, Cmid)
    wd = 0.1 * jax.random.normal(ks[1], (3, 3, cmid), f32)     # depthwise (3, 3, Cmid)
    w3 = 0.1 * jax.random.normal(ks[2], (cmid, oup), f32)      # 1x1 project (Cmid, Cout)

    def bn_raw(k, c):
        k1, k2, k3, k4 = jax.random.split(k, 4)
        gamma = 1.0 + 0.1 * jax.random.normal(k1, (c,), f32)
        beta = 0.1 * jax.random.normal(k2, (c,), f32)
        mean = 0.1 * jax.random.normal(k3, (c,), f32)
        var = jax.random.uniform(k4, (c,), f32, 0.5, 1.5)
        return gamma, beta, mean, var

    bn1 = bn_raw(ks[3], cmid)
    bn2 = bn_raw(ks[4], cmid)
    bn3 = bn_raw(ks[5], oup)

    s1, b1 = _fold_bn(*bn1)
    sd, bd = _fold_bn(*bn2)
    s3, b3 = _fold_bn(*bn3)

    params = dict(w1=w1, s1=s1, b1=b1, wd=wd, sd=sd, bd=bd, w3=w3, s3=s3, b3=b3)
    raw = dict(w1=w1, wd=wd, w3=w3, bn1=bn1, bn2=bn2, bn3=bn3)
    return params, raw


def reference_forward(x_nchw, raw, *, stride, dilate):
    """Pure-JAX reference mirroring the PyTorch module (eval-mode BN)."""
    def bn(x, stats):
        gamma, beta, mean, var = stats
        sh = (1, -1, 1, 1)
        return (x - mean.reshape(sh)) / jnp.sqrt(var.reshape(sh) + 1e-5) \
            * gamma.reshape(sh) + beta.reshape(sh)

    cin, cmid = raw["w1"].shape
    cout = raw["w3"].shape[1]
    dn = ("NCHW", "OIHW", "NCHW")

    w1 = raw["w1"].T.reshape(cmid, cin, 1, 1)
    wd = jnp.transpose(raw["wd"], (2, 0, 1)).reshape(cmid, 1, 3, 3)
    w3 = raw["w3"].T.reshape(cout, cmid, 1, 1)

    h = lax.conv_general_dilated(x_nchw, w1, (1, 1), "VALID", dimension_numbers=dn)
    h = jnp.clip(bn(h, raw["bn1"]), 0.0, 6.0)
    h = lax.conv_general_dilated(h, wd, (stride, stride),
                                 [(dilate, dilate), (dilate, dilate)],
                                 rhs_dilation=(dilate, dilate),
                                 dimension_numbers=dn, feature_group_count=cmid)
    h = jnp.clip(bn(h, raw["bn2"]), 0.0, 6.0)
    h = lax.conv_general_dilated(h, w3, (1, 1), "VALID", dimension_numbers=dn)
    h = bn(h, raw["bn3"])
    if stride == 1 and cin == cout:
        return x_nchw + h
    return h


# ---------------------------------- main --------------------------------------

if __name__ == "__main__":
    key = jax.random.PRNGKey(0)

    #          inp oup stride dilate expand  N   H   W
    configs = [(8,  8,  1,     1,     4,      2, 16, 16),   # residual path
               (8, 16,  2,     1,     4,      2, 16, 16),   # stride-2, no residual
               (8,  8,  1,     2,     4,      1, 16, 16)]   # dilated, residual

    for cfg_idx, (inp, oup, stride, dilate, er, N, H, W) in enumerate(configs):
        key, kx, kp = jax.random.split(key, 3)
        x = jax.random.normal(kx, (N, inp, H, W), jnp.float32)
        params, raw = make_params(kp, inp, oup, er)
        ref = reference_forward(x, raw, stride=stride, dilate=dilate)

        # exact (f32) path
        out = inverted_residual_forward(x, params, stride=stride, dilate=dilate,
                                        use_bf16=False)
        out = jax.block_until_ready(out)
        assert out.shape == ref.shape, (cfg_idx, out.shape, ref.shape)
        assert jnp.allclose(out, ref, atol=1e-4, rtol=1e-4), \
            (cfg_idx, "f32", float(jnp.max(jnp.abs(out - ref))))

        # bf16-MXU path (f32 accumulation), looser tolerance
        out_bf = inverted_residual_forward(x, params, stride=stride, dilate=dilate,
                                           use_bf16=True)
        out_bf = jax.block_until_ready(out_bf)
        assert jnp.allclose(out_bf, ref, atol=3e-2, rtol=3e-2), \
            (cfg_idx, "bf16", float(jnp.max(jnp.abs(out_bf - ref))))

    print("KERNEL_OK")
</pallas_src>

<mosaic_0001>
module attributes {stable_mosaic.version = 11 : i64} {
  func.func @_fused_inverted_residual_kernel(%arg0: i32, %arg1: i32, %arg2: memref<1x16x16x8xf32, #tpu.memory_space<vmem>>, %arg3: memref<8x32xf32, #tpu.memory_space<vmem>>, %arg4: memref<1x32xf32, #tpu.memory_space<vmem>>, %arg5: memref<3x3x32xf32, #tpu.memory_space<vmem>>, %arg6: memref<1x1x32xf32, #tpu.memory_space<vmem>>, %arg7: memref<32x8xf32, #tpu.memory_space<vmem>>, %arg8: memref<1x8xf32, #tpu.memory_space<vmem>>, %arg9: memref<1x16x16x8xf32, #tpu.memory_space<vmem>>, %arg10: memref<18x18x32xf32, #tpu.memory_space<vmem>>) attributes {dimension_semantics = [#tpu.dimension_semantics<parallel>, #tpu.dimension_semantics<parallel>], iteration_bounds = array<i64: 2, 1>, scalar_prefetch = 0 : i64, scratch_operands = 1 : i64, tpu.core_type = #tpu.core_type<tc>, window_params = [{transform_indices = @transform_0, window_bounds = array<i64: 1, 16, 16, 8>}, {pipeline_mode = #tpu.pipeline_mode<synchronous>, transform_indices = @transform_1, window_bounds = array<i64: 8, 32>}, {pipeline_mode = #tpu.pipeline_mode<synchronous>, transform_indices = @transform_2, window_bounds = array<i64: 1, 32>}, {pipeline_mode = #tpu.pipeline_mode<synchronous>, transform_indices = @transform_3, window_bounds = array<i64: 3, 3, 32>}, {pipeline_mode = #tpu.pipeline_mode<synchronous>, transform_indices = @transform_4, window_bounds = array<i64: 1, 1, 32>}, {pipeline_mode = #tpu.pipeline_mode<synchronous>, transform_indices = @transform_5, window_bounds = array<i64: 32, 8>}, {pipeline_mode = #tpu.pipeline_mode<synchronous>, transform_indices = @transform_6, window_bounds = array<i64: 1, 8>}, {transform_indices = @transform_7, window_bounds = array<i64: 1, 16, 16, 8>}]} {
    %c16_i32 = arith.constant 16 : i32
    %0 = arith.muli %arg1, %c16_i32 : i32
    %c1_i32 = arith.constant 1 : i32
    %1 = arith.subi %0, %c1_i32 : i32
    %c0 = arith.constant 0 : index
    %c0_0 = arith.constant 0 : index
    %2 = vector.load %arg3[%c0, %c0_0] : memref<8x32xf32, #tpu.memory_space<vmem>>, vector<8x32xf32>
    %c0_1 = arith.constant 0 : index
    %c0_2 = arith.constant 0 : index
    %3 = vector.load %arg4[%c0_1, %c0_2] : memref<1x32xf32, #tpu.memory_space<vmem>>, vector<1x32xf32>
    %cst = arith.constant 0.000000e+00 : f32
    %4 = vector.broadcast %cst : f32 to vector<18x1x32xf32>
    %c0_3 = arith.constant 0 : index
    %c0_4 = arith.constant 0 : index
    %c0_5 = arith.constant 0 : index
    %5 = vector.load %arg10[%c0_3, %c0_4, %c0_5] : memref<18x18x32xf32, #tpu.memory_space<vmem>>, vector<18x1x32xf32>
    tpu.vector_store %arg10[%c0_3, %c0_4, %c0_5], %4 {strides = array<i32>} : memref<18x18x32xf32, #tpu.memory_space<vmem>>, vector<18x1x32xf32>,
    %c0_6 = arith.constant 0 : index
    %c17 = arith.constant 17 : index
    %c0_7 = arith.constant 0 : index
    %6 = vector.load %arg10[%c0_6, %c17, %c0_7] : memref<18x18x32xf32, #tpu.memory_space<vmem>>, vector<18x1x32xf32>
    tpu.vector_store %arg10[%c0_6, %c17, %c0_7], %4 {strides = array<i32>} : memref<18x18x32xf32, #tpu.memory_space<vmem>>, vector<18x1x32xf32>,
    %c16_i32_8 = arith.constant 16 : i32
    %7 = arith.muli %arg1, %c16_i32_8 : i32
    %8 = tpu.assume_multiple %7, 8 : i32
    %c0_9 = arith.constant 0 : index
    %9 = arith.index_cast %8 : i32 to index
    %c0_10 = arith.constant 0 : index
    %c0_11 = arith.constant 0 : index
    %10 = vector.load %arg2[%c0_9, %9, %c0_10, %c0_11] : memref<1x16x16x8xf32, #tpu.memory_space<vmem>>, vector<1x16x16x8xf32>
    %11 = vector.shape_cast %10 : vector<1x16x16x8xf32> to vector<16x16x8xf32>
    %12 = vector.shape_cast %11 : vector<16x16x8xf32> to vector<256x8xf32>
    %cst_12 = arith.constant dense<0.000000e+00> : vector<256x32xf32>
    %13 = tpu.matmul %12, %2, %cst_12 {dimension_numbers = #tpu.dot_dimension_numbers<[1], [0], [0], [1], [0, 0, 1, 1], [], []>} : vector<256x8xf32>, vector<8x32xf32>, vector<256x32xf32> -> vector<256x32xf32>
    %14 = vector.broadcast %3 : vector<1x32xf32> to vector<256x32xf32>
    %15 = arith.addf %13, %14 : vector<256x32xf32>
    %cst_13 = arith.constant 0.000000e+00 : f32
    %cst_14 = arith.constant 6.000000e+00 : f32
    %16 = vector.broadcast %cst_13 : f32 to vector<256x32xf32>
    %17 = arith.maximumf %16, %15 : vector<256x32xf32>
    %18 = vector.broadcast %cst_14 : f32 to vector<256x32xf32>
    %19 = arith.minimumf %18, %17 : vector<256x32xf32>
    %20 = vector.shape_cast %19 : vector<256x32xf32> to vector<16x16x32xf32>
    %c1 = arith.constant 1 : index
    %c1_15 = arith.constant 1 : index
    %c0_16 = arith.constant 0 : index
    %21 = vector.load %arg10[%c1, %c1_15, %c0_16] : memref<18x18x32xf32, #tpu.memory_space<vmem>>, vector<16x16x32xf32>
    tpu.vector_store %arg10[%c1, %c1_15, %c0_16], %20 {strides = array<i32>} : memref<18x18x32xf32, #tpu.memory_space<vmem>>, vector<16x16x32xf32>,
    %c0_i32 = arith.constant 0 : i32
    %22 = arith.addi %1, %c0_i32 : i32
    %c0_i32_17 = arith.constant 0 : i32
    %23 = arith.cmpi sge, %22, %c0_i32_17 : i32
    %c16_i32_18 = arith.constant 16 : i32
    %24 = arith.cmpi slt, %22, %c16_i32_18 : i32
    %25 = arith.andi %23, %24 : i1
    %26 = arith.extui %25 : i1 to i32
    %27 = arith.sitofp %26 : i32 to f32
    %c0_i32_19 = arith.constant 0 : i32
    %c15_i32 = arith.constant 15 : i32
    %28 = arith.maxsi %c0_i32_19, %22 : i32
    %29 = arith.minsi %c15_i32, %28 : i32
    %c0_20 = arith.constant 0 : index
    %30 = arith.index_cast %29 : i32 to index
    %c0_21 = arith.constant 0 : index
    %c0_22 = arith.constant 0 : index
    %31 = vector.load %arg2[%c0_20, %30, %c0_21, %c0_22] : memref<1x16x16x8xf32, #tpu.memory_space<vmem>>, vector<1x1x16x8xf32>
    %32 = vector.shape_cast %31 : vector<1x1x16x8xf32> to vector<16x8xf32>
    %cst_23 = arith.constant dense<0.000000e+00> : vector<16x32xf32>
    %33 = tpu.matmul %32, %2, %cst_23 {dimension_numbers = #tpu.dot_dimension_numbers<[1], [0], [0], [1], [0, 0, 1, 1], [], []>} : vector<16x8xf32>, vector<8x32xf32>, vector<16x32xf32> -> vector<16x32xf32>
    %34 = vector.broadcast %3 : vector<1x32xf32> to vector<16x32xf32>
    %35 = arith.addf %33, %34 : vector<16x32xf32>
    %cst_24 = arith.constant 0.000000e+00 : f32
    %cst_25 = arith.constant 6.000000e+00 : f32
    %36 = vector.broadcast %cst_24 : f32 to vector<16x32xf32>
    %37 = arith.maximumf %36, %35 : vector<16x32xf32>
    %38 = vector.broadcast %cst_25 : f32 to vector<16x32xf32>
    %39 = arith.minimumf %38, %37 : vector<16x32xf32>
    %40 = vector.broadcast %27 : f32 to vector<16x32xf32>
    %41 = arith.mulf %39, %40 : vector<16x32xf32>
    %c0_26 = arith.constant 0 : index
    %c1_27 = arith.constant 1 : index
    %c0_28 = arith.constant 0 : index
    %42 = vector.load %arg10[%c0_26, %c1_27, %c0_28] : memref<18x18x32xf32, #tpu.memory_space<vmem>>, vector<1x16x32xf32>
    %43 = vector.shape_cast %42 : vector<1x16x32xf32> to vector<16x32xf32>
    %44 = vector.shape_cast %41 : vector<16x32xf32> to vector<1x16x32xf32>
    tpu.vector_store %arg10[%c0_26, %c1_27, %c0_28], %44 {strides = array<i32>} : memref<18x18x32xf32, #tpu.memory_space<vmem>>, vector<1x16x32xf32>,
    %c17_i32 = arith.constant 17 : i32
    %45 = arith.addi %1, %c17_i32 : i32
    %c0_i32_29 = arith.constant 0 : i32
    %46 = arith.cmpi sge, %45, %c0_i32_29 : i32
    %c16_i32_30 = arith.constant 16 : i32
    %47 = arith.cmpi slt, %45, %c16_i32_30 : i32
    %48 = arith.andi %46, %47 : i1
    %49 = arith.extui %48 : i1 to i32
    %50 = arith.sitofp %49 : i32 to f32
    %c0_i32_31 = arith.constant 0 : i32
    %c15_i32_32 = arith.constant 15 : i32
    %51 = arith.maxsi %c0_i32_31, %45 : i32
    %52 = arith.minsi %c15_i32_32, %51 : i32
    %c0_33 = arith.constant 0 : index
    %53 = arith.index_cast %52 : i32 to index
    %c0_34 = arith.constant 0 : index
    %c0_35 = arith.constant 0 : index
    %54 = vector.load %arg2[%c0_33, %53, %c0_34, %c0_35] : memref<1x16x16x8xf32, #tpu.memory_space<vmem>>, vector<1x1x16x8xf32>
    %55 = vector.shape_cast %54 : vector<1x1x16x8xf32> to vector<16x8xf32>
    %cst_36 = arith.constant dense<0.000000e+00> : vector<16x32xf32>
    %56 = tpu.matmul %55, %2, %cst_36 {dimension_numbers = #tpu.dot_dimension_numbers<[1], [0], [0], [1], [0, 0, 1, 1], [], []>} : vector<16x8xf32>, vector<8x32xf32>, vector<16x32xf32> -> vector<16x32xf32>
    %57 = vector.broadcast %3 : vector<1x32xf32> to vector<16x32xf32>
    %58 = arith.addf %56, %57 : vector<16x32xf32>
    %cst_37 = arith.constant 0.000000e+00 : f32
    %cst_38 = arith.constant 6.000000e+00 : f32
    %59 = vector.broadcast %cst_37 : f32 to vector<16x32xf32>
    %60 = arith.maximumf %59, %58 : vector<16x32xf32>
    %61 = vector.broadcast %cst_38 : f32 to vector<16x32xf32>
    %62 = arith.minimumf %61, %60 : vector<16x32xf32>
    %63 = vector.broadcast %50 : f32 to vector<16x32xf32>
    %64 = arith.mulf %62, %63 : vector<16x32xf32>
    %c17_39 = arith.constant 17 : index
    %c1_40 = arith.constant 1 : index
    %c0_41 = arith.constant 0 : index
    %65 = vector.load %arg10[%c17_39, %c1_40, %c0_41] : memref<18x18x32xf32, #tpu.memory_space<vmem>>, vector<1x16x32xf32>
    %66 = vector.shape_cast %65 : vector<1x16x32xf32> to vector<16x32xf32>
    %67 = vector.shape_cast %64 : vector<16x32xf32> to vector<1x16x32xf32>
    tpu.vector_store %arg10[%c17_39, %c1_40, %c0_41], %67 {strides = array<i32>} : memref<18x18x32xf32, #tpu.memory_space<vmem>>, vector<1x16x32xf32>,
    %c0_42 = arith.constant 0 : index
    %c0_43 = arith.constant 0 : index
    %c0_44 = arith.constant 0 : index
    %68 = vector.load %arg10[%c0_42, %c0_43, %c0_44] : memref<18x18x32xf32, #tpu.memory_space<vmem>>, vector<16x16x32xf32>
    %c0_45 = arith.constant 0 : index
    %c0_46 = arith.constant 0 : index
    %c0_47 = arith.constant 0 : index
    %69 = vector.load %arg5[%c0_45, %c0_46, %c0_47] : memref<3x3x32xf32, #tpu.memory_space<vmem>>, vector<1x1x32xf32>
    %70 = vector.broadcast %69 : vector<1x1x32xf32> to vector<16x16x32xf32>
    %71 = arith.mulf %68, %70 : vector<16x16x32xf32>
    %c0_48 = arith.constant 0 : index
    %c1_49 = arith.constant 1 : index
    %c0_50 = arith.constant 0 : index
    %72 = vector.load %arg10[%c0_48, %c1_49, %c0_50] : memref<18x18x32xf32, #tpu.memory_space<vmem>>, vector<16x16x32xf32>
    %c0_51 = arith.constant 0 : index
    %c1_52 = arith.constant 1 : index
    %c0_53 = arith.constant 0 : index
    %73 = vector.load %arg5[%c0_51, %c1_52, %c0_53] : memref<3x3x32xf32, #tpu.memory_space<vmem>>, vector<1x1x32xf32>
    %74 = vector.broadcast %73 : vector<1x1x32xf32> to vector<16x16x32xf32>
    %75 = arith.mulf %72, %74 : vector<16x16x32xf32>
    %76 = arith.addf %71, %75 : vector<16x16x32xf32>
    %c0_54 = arith.constant 0 : index
    %c2 = arith.constant 2 : index
    %c0_55 = arith.constant 0 : index
    %77 = vector.load %arg10[%c0_54, %c2, %c0_55] : memref<18x18x32xf32, #tpu.memory_space<vmem>>, vector<16x16x32xf32>
    %c0_56 = arith.constant 0 : index
    %c2_57 = arith.constant 2 : index
    %c0_58 = arith.constant 0 : index
    %78 = vector.load %arg5[%c0_56, %c2_57, %c0_58] : memref<3x3x32xf32, #tpu.memory_space<vmem>>, vector<1x1x32xf32>
    %79 = vector.broadcast %78 : vector<1x1x32xf32> to vector<16x16x32xf32>
    %80 = arith.mulf %77, %79 : vector<16x16x32xf32>
    %81 = arith.addf %76, %80 : vector<16x16x32xf32>
    %c1_59 = arith.constant 1 : index
    %c0_60 = arith.constant 0 : index
    %c0_61 = arith.constant 0 : index
    %82 = vector.load %arg10[%c1_59, %c0_60, %c0_61] : memref<18x18x32xf32, #tpu.memory_space<vmem>>, vector<16x16x32xf32>
    %c1_62 = arith.constant 1 : index
    %c0_63 = arith.constant 0 : index
    %c0_64 = arith.constant 0 : index
    %83 = vector.load %arg5[%c1_62, %c0_63, %c0_64] : memref<3x3x32xf32, #tpu.memory_space<vmem>>, vector<1x1x32xf32>
    %84 = vector.broadcast %83 : vector<1x1x32xf32> to vector<16x16x32xf32>
    %85 = arith.mulf %82, %84 : vector<16x16x32xf32>
    %86 = arith.addf %81, %85 : vector<16x16x32xf32>
    %c1_65 = arith.constant 1 : index
    %c1_66 = arith.constant 1 : index
    %c0_67 = arith.constant 0 : index
    %87 = vector.load %arg10[%c1_65, %c1_66, %c0_67] : memref<18x18x32xf32, #tpu.memory_space<vmem>>, vector<16x16x32xf32>
    %c1_68 = arith.constant 1 : index
    %c1_69 = arith.constant 1 : index
    %c0_70 = arith.constant 0 : index
    %88 = vector.load %arg5[%c1_68, %c1_69, %c0_70] : memref<3x3x32xf32, #tpu.memory_space<vmem>>, vector<1x1x32xf32>
    %89 = vector.broadcast %88 : vector<1x1x32xf32> to vector<16x16x32xf32>
    %90 = arith.mulf %87, %89 : vector<16x16x32xf32>
    %91 = arith.addf %86, %90 : vector<16x16x32xf32>
    %c1_71 = arith.constant 1 : index
    %c2_72 = arith.constant 2 : index
    %c0_73 = arith.constant 0 : index
    %92 = vector.load %arg10[%c1_71, %c2_72, %c0_73] : memref<18x18x32xf32, #tpu.memory_space<vmem>>, vector<16x16x32xf32>
    %c1_74 = arith.constant 1 : index
    %c2_75 = arith.constant 2 : index
    %c0_76 = arith.constant 0 : index
    %93 = vector.load %arg5[%c1_74, %c2_75, %c0_76] : memref<3x3x32xf32, #tpu.memory_space<vmem>>, vector<1x1x32xf32>
    %94 = vector.broadcast %93 : vector<1x1x32xf32> to vector<16x16x32xf32>
    %95 = arith.mulf %92, %94 : vector<16x16x32xf32>
    %96 = arith.addf %91, %95 : vector<16x16x32xf32>
    %c2_77 = arith.constant 2 : index
    %c0_78 = arith.constant 0 : index
    %c0_79 = arith.constant 0 : index
    %97 = vector.load %arg10[%c2_77, %c0_78, %c0_79] : memref<18x18x32xf32, #tpu.memory_space<vmem>>, vector<16x16x32xf32>
    %c2_80 = arith.constant 2 : index
    %c0_81 = arith.constant 0 : index
    %c0_82 = arith.constant 0 : index
    %98 = vector.load %arg5[%c2_80, %c0_81, %c0_82] : memref<3x3x32xf32, #tpu.memory_space<vmem>>, vector<1x1x32xf32>
    %99 = vector.broadcast %98 : vector<1x1x32xf32> to vector<16x16x32xf32>
    %100 = arith.mulf %97, %99 : vector<16x16x32xf32>
    %101 = arith.addf %96, %100 : vector<16x16x32xf32>
    %c2_83 = arith.constant 2 : index
    %c1_84 = arith.constant 1 : index
    %c0_85 = arith.constant 0 : index
    %102 = vector.load %arg10[%c2_83, %c1_84, %c0_85] : memref<18x18x32xf32, #tpu.memory_space<vmem>>, vector<16x16x32xf32>
    %c2_86 = arith.constant 2 : index
    %c1_87 = arith.constant 1 : index
    %c0_88 = arith.constant 0 : index
    %103 = vector.load %arg5[%c2_86, %c1_87, %c0_88] : memref<3x3x32xf32, #tpu.memory_space<vmem>>, vector<1x1x32xf32>
    %104 = vector.broadcast %103 : vector<1x1x32xf32> to vector<16x16x32xf32>
    %105 = arith.mulf %102, %104 : vector<16x16x32xf32>
    %106 = arith.addf %101, %105 : vector<16x16x32xf32>
    %c2_89 = arith.constant 2 : index
    %c2_90 = arith.constant 2 : index
    %c0_91 = arith.constant 0 : index
    %107 = vector.load %arg10[%c2_89, %c2_90, %c0_91] : memref<18x18x32xf32, #tpu.memory_space<vmem>>, vector<16x16x32xf32>
    %c2_92 = arith.constant 2 : index
    %c2_93 = arith.constant 2 : index
    %c0_94 = arith.constant 0 : index
    %108 = vector.load %arg5[%c2_92, %c2_93, %c0_94] : memref<3x3x32xf32, #tpu.memory_space<vmem>>, vector<1x1x32xf32>
    %109 = vector.broadcast %108 : vector<1x1x32xf32> to vector<16x16x32xf32>
    %110 = arith.mulf %107, %109 : vector<16x16x32xf32>
    %111 = arith.addf %106, %110 : vector<16x16x32xf32>
    %c0_95 = arith.constant 0 : index
    %c0_96 = arith.constant 0 : index
    %c0_97 = arith.constant 0 : index
    %112 = vector.load %arg6[%c0_95, %c0_96, %c0_97] : memref<1x1x32xf32, #tpu.memory_space<vmem>>, vector<1x1x32xf32>
    %113 = vector.broadcast %112 : vector<1x1x32xf32> to vector<16x16x32xf32>
    %114 = arith.addf %111, %113 : vector<16x16x32xf32>
    %cst_98 = arith.constant 0.000000e+00 : f32
    %cst_99 = arith.constant 6.000000e+00 : f32
    %115 = vector.broadcast %cst_98 : f32 to vector<16x16x32xf32>
    %116 = arith.maximumf %115, %114 : vector<16x16x32xf32>
    %117 = vector.broadcast %cst_99 : f32 to vector<16x16x32xf32>
    %118 = arith.minimumf %117, %116 : vector<16x16x32xf32>
    %119 = vector.shape_cast %118 : vector<16x16x32xf32> to vector<256x32xf32>
    %c0_100 = arith.constant 0 : index
    %c0_101 = arith.constant 0 : index
    %120 = vector.load %arg7[%c0_100, %c0_101] : memref<32x8xf32, #tpu.memory_space<vmem>>, vector<32x8xf32>
    %cst_102 = arith.constant dense<0.000000e+00> : vector<256x8xf32>
    %121 = tpu.matmul %119, %120, %cst_102 {dimension_numbers = #tpu.dot_dimension_numbers<[1], [0], [0], [1], [0, 0, 1, 1], [], []>} : vector<256x32xf32>, vector<32x8xf32>, vector<256x8xf32> -> vector<256x8xf32>
    %c0_103 = arith.constant 0 : index
    %c0_104 = arith.constant 0 : index
    %122 = vector.load %arg8[%c0_103, %c0_104] : memref<1x8xf32, #tpu.memory_space<vmem>>, vector<1x8xf32>
    %123 = vector.broadcast %122 : vector<1x8xf32> to vector<256x8xf32>
    %124 = arith.addf %121, %123 : vector<256x8xf32>
    %125 = vector.shape_cast %124 : vector<256x8xf32> to vector<16x16x8xf32>
    %c16_i32_105 = arith.constant 16 : i32
    %126 = arith.muli %arg1, %c16_i32_105 : i32
    %127 = tpu.assume_multiple %126, 8 : i32
    %c0_106 = arith.constant 0 : index
    %128 = arith.index_cast %127 : i32 to index
    %c0_107 = arith.constant 0 : index
    %c0_108 = arith.constant 0 : index
    %129 = vector.load %arg2[%c0_106, %128, %c0_107, %c0_108] : memref<1x16x16x8xf32, #tpu.memory_space<vmem>>, vector<1x16x16x8xf32>
    %130 = vector.shape_cast %129 : vector<1x16x16x8xf32> to vector<16x16x8xf32>
    %131 = arith.addf %125, %130 : vector<16x16x8xf32>
    %c0_109 = arith.constant 0 : index
    %c0_110 = arith.constant 0 : index
    %c0_111 = arith.constant 0 : index
    %c0_112 = arith.constant 0 : index
    %132 = vector.load %arg9[%c0_109, %c0_110, %c0_111, %c0_112] : memref<1x16x16x8xf32, #tpu.memory_space<vmem>>, vector<1x16x16x8xf32>
    %133 = vector.shape_cast %132 : vector<1x16x16x8xf32> to vector<16x16x8xf32>
    %134 = vector.shape_cast %131 : vector<16x16x8xf32> to vector<1x16x16x8xf32>
    tpu.vector_store %arg9[%c0_109, %c0_110, %c0_111, %c0_112], %134 {strides = array<i32>} : memref<1x16x16x8xf32, #tpu.memory_space<vmem>>, vector<1x16x16x8xf32>,
    return
  }
  func.func @transform_0(%arg0: i32, %arg1: i32) -> (i32, i32, i32, i32) {
    %c0_i32 = arith.constant 0 : i32
    %c0_i32_0 = arith.constant 0 : i32
    %c0_i32_1 = arith.constant 0 : i32
    %c0_i32_2 = arith.constant 0 : i32
    return %arg0, %c0_i32, %c0_i32_0, %c0_i32_1 : i32, i32, i32, i32
  }
  func.func @transform_1(%arg0: i32, %arg1: i32) -> (i32, i32) {
    %c0_i32 = arith.constant 0 : i32
    %c0_i32_0 = arith.constant 0 : i32
    %c0_i32_1 = arith.constant 0 : i32
    return %c0_i32, %c0_i32_0 : i32, i32
  }
  func.func @transform_2(%arg0: i32, %arg1: i32) -> (i32, i32) {
    %c0_i32 = arith.constant 0 : i32
    %c0_i32_0 = arith.constant 0 : i32
    %c0_i32_1 = arith.constant 0 : i32
    return %c0_i32, %c0_i32_0 : i32, i32
  }
  func.func @transform_3(%arg0: i32, %arg1: i32) -> (i32, i32, i32) {
    %c0_i32 = arith.constant 0 : i32
    %c0_i32_0 = arith.constant 0 : i32
    %c0_i32_1 = arith.constant 0 : i32
    %c0_i32_2 = arith.constant 0 : i32
    return %c0_i32, %c0_i32_0, %c0_i32_1 : i32, i32, i32
  }
  func.func @transform_4(%arg0: i32, %arg1: i32) -> (i32, i32, i32) {
    %c0_i32 = arith.constant 0 : i32
    %c0_i32_0 = arith.constant 0 : i32
    %c0_i32_1 = arith.constant 0 : i32
    %c0_i32_2 = arith.constant 0 : i32
    return %c0_i32, %c0_i32_0, %c0_i32_1 : i32, i32, i32
  }
  func.func @transform_5(%arg0: i32, %arg1: i32) -> (i32, i32) {
    %c0_i32 = arith.constant 0 : i32
    %c0_i32_0 = arith.constant 0 : i32
    %c0_i32_1 = arith.constant 0 : i32
    return %c0_i32, %c0_i32_0 : i32, i32
  }
  func.func @transform_6(%arg0: i32, %arg1: i32) -> (i32, i32) {
    %c0_i32 = arith.constant 0 : i32
    %c0_i32_0 = arith.constant 0 : i32
    %c0_i32_1 = arith.constant 0 : i32
    return %c0_i32, %c0_i32_0 : i32, i32
  }
  func.func @transform_7(%arg0: i32, %arg1: i32) -> (i32, i32, i32, i32) {
    %c0_i32 = arith.constant 0 : i32
    %c0_i32_0 = arith.constant 0 : i32
    %c0_i32_1 = arith.constant 0 : i32
    return %arg0, %arg1, %c0_i32, %c0_i32_0 : i32, i32, i32, i32
  }
}

</mosaic_0001>

<bundles_post_ra>
// kernel: tpu_custom_call.1
= control target key start
LH: loop header
LB: loop body
LE: loop exit
PB: predicated region body
PF: predicated region fallthrough
CT: control target
= control target key end

     0   :  { %s2362_s24 = smov 0   ;;  %s2364_s25 = smov 0   ;;  %s3398_s0 = inlined_call_operand.vmem [shape: f32[2,16,16,8], index: 0, kind: input, shape index: {}]   ;;  %s3399_s1 = inlined_call_operand.vmem [shape: f32[8,32], index: 1, kind: input, shape index: {}]   ;;  %s3400_s2 = inlined_call_operand.vmem [shape: f32[1,32], index: 2, kind: input, shape index: {}]   ;;  %s3401_s3 = inlined_call_operand.vmem [shape: f32[3,3,32], index: 3, kind: input, shape index: {}]   ;;  %s3402_s4 = inlined_call_operand.vmem [shape: f32[1,1,32], index: 4, kind: input, shape index: {}]   ;;  %s3403_s5 = inlined_call_operand.vmem [shape: f32[32,8], index: 5, kind: input, shape index: {}]   ;;  %s3404_s6 = inlined_call_operand.vmem [shape: f32[1,8], index: 6, kind: input, shape index: {}]   ;;  %s3405_s7 = inlined_call_operand.vmem [shape: f32[2,16,16,8], index: 7, kind: output, shape index: {}]  }
   0x1   :  { %s2366_s26 = smov 0  }
   0x2 LB: > { %s29_s27 = sadd.s32 1, %s2315_s25  ;;  %p2159_p0 = scmp.ge.s32.totalorder %s2319_s26, 1  ;;  %s2319_s26 = sphi %s2366_s26, %s17_s26   ;;  %s2315_s25 = sphi %s2364_s25, %s3407_s25   ;;  %s2311_s24 = sphi %s2362_s24, %s3406_s24  }
   0x3   : > { %p31_p1 = scmp.ge.s32.totalorder %s29_s27, 2  ;;  %p251_p2 = scmp.lt.s32.totalorder %s2319_s26, 3 }
   0x5   : > { %s3409_s27 = smov (%p31_p1, %s29_s27), 0  ;;  %p252_p3 = pnand %p2159_p0, %p251_p2 }
   0x6   : > { %p288_p4 = scmp.lt.s32.totalorder (!%p252_p3), %s2311_s24, 1 }
   0x7   : > { %255 = sbr.rel (%p252_p3) target bundleno = 572 (0x23c), region = 48 }
   0xc   : > { %v306_v0 = vld [vmem:[%s3399_s1] sm:$0xff]  ;;  %s3411_s24 = smov (!%p288_p4, %s2311_s24), 1  ;;  %vm382_vm0 = vcmask 64512   ;;  %vm308_vm1 = vcmask 253952   ;;  %v2321_v19 = vmov 0.0   ;;  %vm657_vm2 = vcmask 261120  }
   0xd   : > { %494 = vmatpush.msra.mxu0 %v306_v0  ;;  %725 = vmatpush.msra.mxu1 %v306_v0  ;;  %s2242_s30 = sshll.u32 %s3411_s24, 8  ;;  %309 = vst.msk [vmem:[#allocation2] sm:$0x1] %vm308_vm1, %v2321_v19  ;;  %v2486_v25 = vld [vmem:[%s3400_s2] ss:$0 sm:$0xff]  ;;  %v1752_v43 = vld [vmem:[%s3403_s5 + $0x18] sm:$0xff] }
   0xe   : > { %2244 = vmatpush.msra.mxu2 %v306_v0  ;;  %s2391_s10 = scalar_lea.vmem %s3398_s0, %s2242_s30  ;;  %310 = vst.msk [vmem:[#allocation2 + $0x18] sm:$0x1] %vm308_vm1, %v2321_v19  ;;  %2245 = vmatpush.msra.mxu3 %v1752_v43  ;;  %v1751_v46 = vld [vmem:[%s3403_s5 + $0x10] sm:$0xff]  ;;  %v1750_v49 = vld [vmem:[%s3403_s5 + $0x8] sm:$0xff]  ;;  %v1749_v52 = vld [vmem:[%s3403_s5] sm:$0xff]  ;;  %s3103_s16 = scalar_lea.vmem %s3405_s7, %s2242_s30 }
   0xf   : > { %v347_v1 = vld [vmem:[%s2391_s10] sm:$0xff]  ;;  %v348_v2 = vld [vmem:[%s2391_s10 + $0x8] sm:$0xff]  ;;  %v349_v3 = vld [vmem:[%s2391_s10 + $0x10] sm:$0xff]  ;;  %311 = vst.msk [vmem:[#allocation2 + $0x30] sm:$0x1] %vm308_vm1, %v2321_v19  ;;  %1865 = vmatpush.msrb.mxu1 %v1752_v43 }
  0x10   : > { %778 = vmatpush.msrb.mxu2 %v306_v0  ;;  %2164 = vmatmul.msk.f32.vlgmr.msra.gmra.mxu0 %vm382_vm0, %v347_v1  ;;  %v350_v4 = vld [vmem:[%s2391_s10 + $0x18] sm:$0xff]  ;;  %v351_v5 = vld [vmem:[%s2391_s10 + $0x20] sm:$0xff]  ;;  %v352_v6 = vld [vmem:[%s2391_s10 + $0x28] sm:$0xff]  ;;  %312 = vst.msk [vmem:[#allocation2 + $0x48] sm:$0x1] %vm308_vm1, %v2321_v19 }
  0x11   : > { %2196 = vmatmul.msk.f32.vlgmr.msra.gmra.mxu1 %vm382_vm0, %v347_v1  ;;  %v353_v7 = vld [vmem:[%s2391_s10 + $0x30] sm:$0xff]  ;;  %v354_v8 = vld [vmem:[%s2391_s10 + $0x38] sm:$0xff]  ;;  %v355_v9 = vld [vmem:[%s2391_s10 + $0x40] sm:$0xff]  ;;  %313 = vst.msk [vmem:[#allocation2 + $0x60] sm:$0x1] %vm308_vm1, %v2321_v19  ;;  %2246 = vmatpush.msra.mxu3 %v1751_v46 }
  0x12   : > { %v365_v10 = vld [vmem:[%s2391_s10 + $0x90] sm:$0xff]  ;;  %v356_v11 = vld [vmem:[%s2391_s10 + $0x48] sm:$0xff]  ;;  %v366_v12 = vld [vmem:[%s2391_s10 + $0x98] sm:$0xff]  ;;  %314 = vst.msk [vmem:[#allocation2 + $0x78] sm:$0x1] %vm308_vm1, %v2321_v19  ;;  %1866 = vmatpush.msrb.mxu1 %v1751_v46 }
  0x13   : > { %2182 = vmatmul.msk.f32.vlgmr.msra.gmra.mxu2 %vm382_vm0, %v365_v10  ;;  %v357_v13 = vld [vmem:[%s2391_s10 + $0x50] sm:$0xff]  ;;  %v367_v14 = vld [vmem:[%s2391_s10 + $0xa0] sm:$0xff]  ;;  %v358_v15 = vld [vmem:[%s2391_s10 + $0x58] sm:$0xff]  ;;  %315 = vst.msk [vmem:[#allocation2 + $0x90] sm:$0x1] %vm308_vm1, %v2321_v19  ;;  %2247 = vmatpush.msra.mxu3 %v1750_v49 }
  0x14   : > { %v368_v16 = vld [vmem:[%s2391_s10 + $0xa8] sm:$0xff]  ;;  %v359_v17 = vld [vmem:[%s2391_s10 + $0x60] sm:$0xff]  ;;  %v369_v18 = vld [vmem:[%s2391_s10 + $0xb0] sm:$0xff]  ;;  %316 = vst.msk [vmem:[#allocation2 + $0xa8] sm:$0x1] %vm308_vm1, %v2321_v19  ;;  %1867 = vmatpush.msrb.mxu1 %v1750_v49 }
  0x15   : > { %v360_v20 = vld [vmem:[%s2391_s10 + $0x68] sm:$0xff]  ;;  %v370_v21 = vld [vmem:[%s2391_s10 + $0xb8] sm:$0xff]  ;;  %v361_v22 = vld [vmem:[%s2391_s10 + $0x70] sm:$0xff]  ;;  %317 = vst.msk [vmem:[#allocation2 + $0xc0] sm:$0x1] %vm308_vm1, %v2321_v19  ;;  %2248 = vmatpush.msra.mxu3 %v1749_v52 }
  0x16   : > { %318 = vst.msk [vmem:[#allocation2 + $0xd8] sm:$0x1] %vm308_vm1, %v2321_v19  ;;  %v371_v23 = vld [vmem:[%s2391_s10 + $0xc0] sm:$0xff]  ;;  %v362_v24 = vld [vmem:[%s2391_s10 + $0x78] sm:$0xff]  ;;  %v372_v26 = vld [vmem:[%s2391_s10 + $0xc8] sm:$0xff]  ;;  %1868 = vmatpush.msrb.mxu1 %v1749_v52 }
  0x17   : > { %319 = vst.msk [vmem:[#allocation2 + $0xf0] sm:$0x1] %vm308_vm1, %v2321_v19  ;;  %v363_v29 = vld [vmem:[%s2391_s10 + $0x80] sm:$0xff]  ;;  %v373_v36 = vld [vmem:[%s2391_s10 + $0xd0] sm:$0xff]  ;;  %v364_v40 = vld [vmem:[%s2391_s10 + $0x88] sm:$0xff] }
  0x18   : > { %2165 = vmatmul.msk.f32.gmra.mxu0 %vm382_vm0, %v348_v2  ;;  %320 = vst.msk [vmem:[#allocation2 + $0x108] sm:$0x1] %vm308_vm1, %v2321_v19  ;;  %v374_v50 = vld [vmem:[%s2391_s10 + $0xd8] sm:$0xff]  ;;  %v2552_v57 = vld [vmem:[%s3401_s3] ss:$0 sm:$0xff] }
  0x19   : > { %2197 = vmatmul.msk.f32.gmra.mxu1 %vm382_vm0, %v348_v2  ;;  %321 = vst.msk [vmem:[#allocation2 + $0x120] sm:$0x1] %vm308_vm1, %v2321_v19  ;;  %v2557_v58 = vld [vmem:[%s3401_s3 + $0x1] ss:$0 sm:$0xff]  ;;  %v2564_v63 = vld [vmem:[%s3401_s3 + $0x4] ss:$0 sm:$0xff] }
  0x1a   : > { %322 = vst.msk [vmem:[#allocation2 + $0x138] sm:$0x1] %vm308_vm1, %v2321_v19  ;;  %v375_v0 = vld [vmem:[%s2391_s10 + $0xe0] sm:$0xff] }
  0x1b   : > { %2183 = vmatmul.msk.f32.gmra.mxu2 %vm382_vm0, %v366_v12  ;;  %323 = vst.msk [vmem:[#allocation2 + $0x150] sm:$0x1] %vm308_vm1, %v2321_v19  ;;  %v2571_v2 = vld [vmem:[%s3401_s3 + $0x2] ss:$0 sm:$0xff] }
  0x1c   : > { %324 = vst.msk [vmem:[#allocation2 + $0x168] sm:$0x1] %vm308_vm1, %v2321_v19 }
  0x1d   : > { %325 = vst.msk [vmem:[#allocation2 + $0x180] sm:$0x1] %vm308_vm1, %v2321_v19 }
  0x1e   : > { %326 = vst.msk [vmem:[#allocation2 + $0x198] sm:$0x1] %vm308_vm1, %v2321_v19 }
  0x1f   : > { %327 = vst.msk [vmem:[#allocation2 + $0x11] sm:$0x1] %vm308_vm1, %v2321_v19 }
  0x20   : > { %2166 = vmatmul.msk.f32.gmra.mxu0 %vm382_vm0, %v349_v3  ;;  %328 = vst.msk [vmem:[#allocation2 + $0x29] sm:$0x1] %vm308_vm1, %v2321_v19 }
  0x21   : > { %329 = vst.msk [vmem:[#allocation2 + $0x41] sm:$0x1] %vm308_vm1, %v2321_v19 }
  0x22   : > { %330 = vst.msk [vmem:[#allocation2 + $0x59] sm:$0x1] %vm308_vm1, %v2321_v19 }
  0x23   : > { %2184 = vmatmul.msk.f32.gmra.mxu2 %vm382_vm0, %v367_v14  ;;  %331 = vst.msk [vmem:[#allocation2 + $0x71] sm:$0x1] %vm308_vm1, %v2321_v19 }
  0x24   : > { %332 = vst.msk [vmem:[#allocation2 + $0x89] sm:$0x1] %vm308_vm1, %v2321_v19 }
  0x25   : > { %333 = vst.msk [vmem:[#allocation2 + $0xa1] sm:$0x1] %vm308_vm1, %v2321_v19 }
  0x26   : > { %334 = vst.msk [vmem:[#allocation2 + $0xb9] sm:$0x1] %vm308_vm1, %v2321_v19 }
  0x27   : > { %335 = vst.msk [vmem:[#allocation2 + $0xd1] sm:$0x1] %vm308_vm1, %v2321_v19 }
  0x28   : > { %2167 = vmatmul.msk.f32.gmra.mxu0 %vm382_vm0, %v350_v4  ;;  %336 = vst.msk [vmem:[#allocation2 + $0xe9] sm:$0x1] %vm308_vm1, %v2321_v19  ;;  %v2576_v4 = vld [vmem:[%s3401_s3 + $0x5] ss:$0 sm:$0xff] }
  0x29   : > { %337 = vst.msk [vmem:[#allocation2 + $0x101] sm:$0x1] %vm308_vm1, %v2321_v19 }
  0x2a   : > { %338 = vst.msk [vmem:[#allocation2 + $0x119] sm:$0x1] %vm308_vm1, %v2321_v19 }
  0x2b   : > { %2185 = vmatmul.msk.f32.gmra.mxu2 %vm382_vm0, %v368_v16  ;;  %339 = vst.msk [vmem:[#allocation2 + $0x131] sm:$0x1] %vm308_vm1, %v2321_v19 }
  0x2c   : > { %340 = vst.msk [vmem:[#allocation2 + $0x149] sm:$0x1] %vm308_vm1, %v2321_v19 }
  0x2d   : > { %341 = vst.msk [vmem:[#allocation2 + $0x161] sm:$0x1] %vm308_vm1, %v2321_v19 }
  0x2e   : > { %342 = vst.msk [vmem:[#allocation2 + $0x179] sm:$0x1] %vm308_vm1, %v2321_v19 }
  0x2f   : > { %343 = vst.msk [vmem:[#allocation2 + $0x191] sm:$0x1] %vm308_vm1, %v2321_v19 }
  0x30   : > { %2168 = vmatmul.msk.f32.gmra.mxu0 %vm382_vm0, %v351_v5  ;;  %344 = vst.msk [vmem:[#allocation2 + $0x1a9] sm:$0x1] %vm308_vm1, %v2321_v19 }
  0x33   : > { %2186 = vmatmul.msk.f32.gmra.mxu2 %vm382_vm0, %v369_v18 }
  0x38   : > { %2169 = vmatmul.msk.f32.gmra.mxu0 %vm382_vm0, %v352_v6 }
  0x3b   : > { %2187 = vmatmul.msk.f32.gmra.mxu2 %vm382_vm0, %v370_v21 }
  0x40   : > { %2170 = vmatmul.msk.f32.gmra.mxu0 %vm382_vm0, %v353_v7 }
  0x43   : > { %2188 = vmatmul.msk.f32.gmra.mxu2 %vm382_vm0, %v371_v23 }
  0x48   : > { %2171 = vmatmul.msk.f32.gmra.mxu0 %vm382_vm0, %v354_v8 }
  0x4b   : > { %2189 = vmatmul.msk.f32.gmra.mxu2 %vm382_vm0, %v372_v26 }
  0x50   : > { %2172 = vmatmul.msk.f32.gmra.mxu0 %vm382_vm0, %v355_v9 }
  0x53   : > { %2190 = vmatmul.msk.f32.gmra.mxu2 %vm382_vm0, %v373_v36 }
  0x58   : > { %2173 = vmatmul.msk.f32.gmra.mxu0 %vm382_vm0, %v356_v11 }
  0x5b   : > { %2191 = vmatmul.msk.f32.gmra.mxu2 %vm382_vm0, %v374_v50 }
  0x60   : > { %2174 = vmatmul.msk.f32.gmra.mxu0 %vm382_vm0, %v357_v13 }
  0x63   : > { %2192 = vmatmul.msk.f32.gmra.mxu2 %vm382_vm0, %v375_v0 }
  0x68   : > { %2175 = vmatmul.msk.f32.gmra.mxu0 %vm382_vm0, %v358_v15 }
  0x70   : > { %2176 = vmatmul.msk.f32.gmra.mxu0 %vm382_vm0, %v359_v17 }
  0x78   : > { %2177 = vmatmul.msk.f32.gmra.mxu0 %vm382_vm0, %v360_v20  ;;  %v2588_v20 = vld [vmem:[%s3401_s3 + $0x6] ss:$0 sm:$0xff] }
  0x80   : > { %2178 = vmatmul.msk.f32.gmra.mxu0 %vm382_vm0, %v361_v22 }
  0x88   : > { %2179 = vmatmul.msk.f32.gmra.mxu0 %vm382_vm0, %v362_v24 }
  0x8d   : > { %v496_v27 = vpop.f32.mrf.mxu0 }
  0x8e   : > { %v727_v28 = vpop.f32.mrf.mxu1  ;;  %v497_v30 = vadd.f32 %v2486_v25, %v496_v27  ;;  %v2594_v27 = vld [vmem:[%s3401_s3 + $0x8] ss:$0 sm:$0xff] }
  0x8f   : > { %v728_v31 = vadd.f32 %v2486_v25, %v727_v28 }
  0x90   : > { %v592_v32 = vmax.f32 %v497_v30, 0.0  ;;  %2180 = vmatmul.msk.f32.gmra.mxu0 %vm382_vm0, %v363_v29 }
  0x91   : > { %v733_v33 = vmax.f32 %v728_v31, 0.0 }
  0x92   : > { %v624_v34 = vmin.f32 %v592_v32, 6.0 }
  0x93   : > { %v735_v35 = vmin.f32 %v733_v33, 6.0 }
  0x94   : > { %658 = vst.msk [vmem:[#allocation2 + $0x19] sm:$0xff] %vm657_vm2, %v624_v34 }
  0x95   : > { %v738_v37 = vmul.f32 0.0, %v735_v35  ;;  %v499_v38 = vpop.f32.mrf.mxu0  ;;  %v376_v35 = vld [vmem:[%s2391_s10 + $0xe8] sm:$0xff] }
  0x96   : > { %v730_v39 = vpop.f32.mrf.mxu1  ;;  %v500_v41 = vadd.f32 %v2486_v25, %v499_v38  ;;  %2193 = vmatmul.msk.f32.gmra.mxu2 %vm382_vm0, %v376_v35 }
  0x97   : > { %740 = vst.msk [vmem:[#allocation2 + $0x1] sm:$0xff] %vm657_vm2, %v738_v37  ;;  %v731_v42 = vadd.f32 %v2486_v25, %v730_v39 }
  0x98   : > { %v593_v44 = vmax.f32 %v500_v41, 0.0  ;;  %2181 = vmatmul.msk.f32.gmra.mxu0 %vm382_vm0, %v364_v40  ;;  %v2609_v40 = vld [vmem:[%s3401_s3 + $0x9] ss:$0 sm:$0xff] }
  0x99   : > { %v734_v45 = vmax.f32 %v731_v42, 0.0 }
  0x9a   : > { %v625_v47 = vmin.f32 %v593_v44, 6.0 }
  0x9b   : > { %v736_v48 = vmin.f32 %v734_v45, 6.0  ;;  %v1058_v3 = vld [vmem:[#allocation2 + $0x18] sm:$0xff] }
  0x9c   : > { %659 = vst.msk [vmem:[#allocation2 + $0x21] sm:$0xff] %vm657_vm2, %v625_v47  ;;  %v1157_v11 = vld [vmem:[#allocation2 + $0x19] sm:$0xff]  ;;  %v1093_v19 = vmul.f32 %v2564_v63, %v1058_v3  ;;  %v832_v44 = vmul.f32 %v2552_v57, %v1058_v3 }
  0x9d   : > { %v739_v51 = vmul.f32 0.0, %v736_v48  ;;  %v502_v53 = vpop.f32.mrf.mxu0  ;;  %v1191_v22 = vmul.f32 %v2576_v4, %v1157_v11  ;;  %v898_v45 = vmul.f32 %v2557_v58, %v1157_v11  ;;  %v2619_v48 = vld [vmem:[%s3401_s3 + $0xa] ss:$0 sm:$0xff]  ;;  %v2634_v3 = vld [vmem:[%s3402_s4] ss:$0 sm:$0xff] }
  0x9e   : > { %v796_v54 = vld [vmem:[#allocation2] sm:$0xff]  ;;  %v503_v56 = vadd.f32 %v2486_v25, %v502_v53 }
  0x9f   : > { %v862_v55 = vld [vmem:[#allocation2 + $0x1] sm:$0xff]  ;;  %741 = vst.msk [vmem:[#allocation2 + $0x9] sm:$0xff] %vm657_vm2, %v739_v51  ;;  %v830_v60 = vmul.f32 %v2552_v57, %v796_v54 }
  0xa0   : > { %v594_v59 = vmax.f32 %v503_v56, 0.0  ;;  %v896_v61 = vmul.f32 %v2557_v58, %v862_v55 }
  0xa2   : > { %v626_v62 = vmin.f32 %v594_v59, 6.0  ;;  %v928_v1 = vadd.f32 %v896_v61, %v830_v60  ;;  %v930_v61 = vadd.f32 %v898_v45, %v832_v44 }
  0xa3   : > { %v1059_v16 = vld [vmem:[#allocation2 + $0x20] sm:$0xff] }
  0xa4   : > { %660 = vst.msk [vmem:[#allocation2 + $0x31] sm:$0xff] %vm657_vm2, %v626_v62  ;;  %v1255_v23 = vld [vmem:[#allocation2 + $0x1a] sm:$0xff]  ;;  %v1094_v29 = vmul.f32 %v2564_v63, %v1059_v16  ;;  %v1256_v43 = vld [vmem:[#allocation2 + $0x22] sm:$0xff]  ;;  %v833_v51 = vmul.f32 %v2552_v57, %v1059_v16 }
  0xa5   : > { %v505_v5 = vpop.f32.mrf.mxu0  ;;  %v1158_v31 = vld [vmem:[#allocation2 + $0x21] sm:$0xff]  ;;  %v1289_v33 = vmul.f32 %v2588_v20, %v1255_v23  ;;  %v996_v50 = vmul.f32 %v2571_v2, %v1255_v23  ;;  %v1290_v55 = vmul.f32 %v2588_v20, %v1256_v43 }
  0xa6   : > { %v960_v6 = vld [vmem:[#allocation2 + $0x2] sm:$0xff]  ;;  %v506_v9 = vadd.f32 %v2486_v25, %v505_v5  ;;  %v961_v14 = vld [vmem:[#allocation2 + $0xa] sm:$0xff]  ;;  %v1192_v41 = vmul.f32 %v2576_v4, %v1158_v31  ;;  %v899_v52 = vmul.f32 %v2557_v58, %v1158_v31 }
  0xa7   : > { %v797_v7 = vld [vmem:[#allocation2 + $0x8] sm:$0xff]  ;;  %v994_v10 = vmul.f32 %v2571_v2, %v960_v6  ;;  %v995_v15 = vmul.f32 %v2571_v2, %v961_v14 }
  0xa8   : > { %v863_v8 = vld [vmem:[#allocation2 + $0x9] sm:$0xff]  ;;  %v831_v12 = vmul.f32 %v2552_v57, %v797_v7  ;;  %v595_v17 = vmax.f32 %v506_v9, 0.0  ;;  %v931_v11 = vadd.f32 %v899_v52, %v833_v51 }
  0xa9   : > { %v897_v13 = vmul.f32 %v2557_v58, %v863_v8  ;;  %v1026_v18 = vadd.f32 %v994_v10, %v928_v1  ;;  %v2638_v7 = vld [vmem:[%s2391_s10 + $0xf0] sm:$0xff]  ;;  %v1028_v10 = vadd.f32 %v996_v50, %v930_v61 }
  0xaa   : > { %v627_v24 = vmin.f32 %v595_v17, 6.0  ;;  %2194 = vmatmul.msk.f32.gmra.mxu2 %vm382_vm0, %v2638_v7  ;;  %v997_v17 = vmul.f32 %v2571_v2, %v1256_v43 }
  0xab   : > { %v929_v21 = vadd.f32 %v897_v13, %v831_v12  ;;  %v1125_v26 = vadd.f32 %v1093_v19, %v1026_v18  ;;  %v2597_v30 = vld [vmem:[#allocation2 + $0x30] sm:$0xff] }
  0xac   : > { %661 = vst.msk [vmem:[#allocation2 + $0x39] sm:$0xff] %vm657_vm2, %v627_v24  ;;  %v1389_v39 = vmul.f32 %v2594_v27, %v2597_v30  ;;  %v2612_v42 = vld [vmem:[#allocation2 + $0x31] sm:$0xff]  ;;  %v1095_v62 = vmul.f32 %v2564_v63, %v2597_v30 }
  0xad   : > { %v1027_v28 = vadd.f32 %v995_v15, %v929_v21  ;;  %v1223_v32 = vadd.f32 %v1191_v22, %v1125_v26  ;;  %v508_v36 = vpop.f32.mrf.mxu0  ;;  %v1487_v54 = vmul.f32 %v2609_v40, %v2612_v42  ;;  %v1193_v24 = vmul.f32 %v2576_v4, %v2612_v42 }
  0xae   : > { %v509_v37 = vadd.f32 %v2486_v25, %v508_v36  ;;  %v1127_v16 = vadd.f32 %v1095_v62, %v1028_v10  ;;  %v1029_v26 = vadd.f32 %v997_v17, %v931_v11  ;;  %v900_v50 = vmul.f32 %v2557_v58, %v2612_v42 }
  0xaf   : > { %v1126_v34 = vadd.f32 %v1094_v29, %v1027_v28  ;;  %v1321_v38 = vadd.f32 %v1289_v33, %v1223_v32 }
  0xb0   : > { %v596_v46 = vmax.f32 %v509_v37, 0.0  ;;  %v1225_v37 = vadd.f32 %v1193_v24, %v1127_v16 }
  0xb1   : > { %v1421_v47 = vadd.f32 %v1389_v39, %v1321_v38  ;;  %v1224_v49 = vadd.f32 %v1192_v41, %v1126_v34  ;;  %v2661_v39 = vld [vmem:[%s2391_s10 + $0xf8] sm:$0xff] }
  0xb2   : > { %v628_v53 = vmin.f32 %v596_v46, 6.0  ;;  %2195 = vmatmul.msk.f32.gmra.mxu2 %vm382_vm0, %v2661_v39 }
  0xb3   : > { %v1551_v56 = vld [vmem:[#allocation2 + $0x32] sm:$0xff]  ;;  %v1519_v0 = vadd.f32 %v1487_v54, %v1421_v47  ;;  %v1322_v5 = vadd.f32 %v1290_v55, %v1224_v49  ;;  %v2640_v9 = vld [vmem:[#allocation2 + $0x3a] sm:$0xff]  ;;  %v834_v49 = vmul.f32 %v2552_v57, %v2597_v30 }
  0xb4   : > { %v1355_v59 = vld [vmem:[#allocation2 + $0x38] sm:$0xff]  ;;  %662 = vst.msk [vmem:[#allocation2 + $0x49] sm:$0xff] %vm657_vm2, %v628_v53  ;;  %v1585_v1 = vmul.f32 %v2619_v48, %v1551_v56  ;;  %v1586_v23 = vmul.f32 %v2619_v48, %v2640_v9  ;;  %v1291_v32 = vmul.f32 %v2588_v20, %v1551_v56  ;;  %v1292_v54 = vmul.f32 %v2588_v20, %v2640_v9 }
  0xb5   : > { %v1454_v60 = vld [vmem:[#allocation2 + $0x39] sm:$0xff]  ;;  %v1390_v6 = vmul.f32 %v2594_v27, %v1355_v59  ;;  %v511_v8 = vpop.f32.mrf.mxu0  ;;  %v1096_v18 = vmul.f32 %v2564_v63, %v1355_v59  ;;  %v998_v55 = vmul.f32 %v2571_v2, %v1551_v56  ;;  %v835_v61 = vmul.f32 %v2552_v57, %v1355_v59 }
  0xb6   : > { %v512_v12 = vadd.f32 %v2486_v25, %v511_v8  ;;  %v1617_v13 = vadd.f32 %v1585_v1, %v1519_v0  ;;  %v1488_v15 = vmul.f32 %v2609_v40, %v1454_v60  ;;  %v1194_v43 = vmul.f32 %v2576_v4, %v1454_v60 }
  0xb7   : > { %v1422_v14 = vadd.f32 %v1390_v6, %v1322_v5  ;;  %v1128_v34 = vadd.f32 %v1096_v18, %v1029_v26  ;;  %v1323_v45 = vadd.f32 %v1291_v32, %v1225_v37  ;;  %v901_v62 = vmul.f32 %v2557_v58, %v1454_v60 }
  0xb8   : > { %v597_v19 = vmax.f32 %v512_v12, 0.0  ;;  %v1653_v21 = vadd.f32 %v2634_v3, %v1617_v13  ;;  %v932_v8 = vadd.f32 %v900_v50, %v834_v49 }
  0xb9   : > { %v1520_v22 = vadd.f32 %v1488_v15, %v1422_v14  ;;  %v1226_v47 = vadd.f32 %v1194_v43, %v1128_v34  ;;  %v933_v15 = vadd.f32 %v901_v62, %v835_v61 }
  0xba   : > { %v629_v28 = vmin.f32 %v597_v19, 6.0  ;;  %v1685_v29 = vmax.f32 %v1653_v21, 0.0  ;;  %v1030_v14 = vadd.f32 %v998_v55, %v932_v8  ;;  %2200 = vmatmul.msk.f32.vlgmr.msrb.gmra.mxu2 %vm382_vm0, %v2638_v7 }
  0xbb   : > { %v1618_v31 = vadd.f32 %v1586_v23, %v1520_v22  ;;  %v2654_v33 = vld [vmem:[#allocation2 + $0x48] sm:$0xff]  ;;  %v1324_v5 = vadd.f32 %v1292_v54, %v1226_v47  ;;  %v999_v22 = vmul.f32 %v2571_v2, %v2640_v9 }
  0xbc   : > { %663 = vst.msk [vmem:[#allocation2 + $0x51] sm:$0xff] %vm657_vm2, %v629_v28  ;;  %v1717_v35 = vmin.f32 %v1685_v29, 6.0  ;;  %v1391_v38 = vmul.f32 %v2594_v27, %v2654_v33  ;;  %v2668_v46 = vld [vmem:[#allocation2 + $0x49] sm:$0xff]  ;;  %v1097_v10 = vmul.f32 %v2564_v63, %v2654_v33 }
  0xbd   : > { %v1654_v36 = vadd.f32 %v2634_v3, %v1618_v31  ;;  %v514_v41 = vpop.f32.mrf.mxu0  ;;  %v1489_v1 = vmul.f32 %v2609_v40, %v2668_v46  ;;  %v1195_v29 = vmul.f32 %v2576_v4, %v2668_v46  ;;  %v1031_v31 = vadd.f32 %v999_v22, %v933_v15 }
  0xbe   : > { %v515_v44 = vadd.f32 %v2486_v25, %v514_v41  ;;  %2208 = vmatmul.msk.f32.vlgmr.msrb.gmra.mxu1 %vm657_vm2, %v1717_v35  ;;  %v1423_v53 = vadd.f32 %v1391_v38, %v1323_v45  ;;  %v1129_v21 = vadd.f32 %v1097_v10, %v1030_v14  ;;  %v902_v54 = vmul.f32 %v2557_v58, %v2668_v46 }
  0xbf   : > { %v1686_v52 = vmax.f32 %v1654_v36, 0.0 }
  0xc0   : > { %v598_v51 = vmax.f32 %v515_v44, 0.0  ;;  %v1521_v56 = vadd.f32 %v1489_v1, %v1423_v53  ;;  %v1227_v43 = vadd.f32 %v1195_v29, %v1129_v21  ;;  %v836_v53 = vmul.f32 %v2552_v57, %v2654_v33 }
  0xc1   : > { %v1718_v11 = vmin.f32 %v1686_v52, 6.0 }
  0xc2   : > { %v630_v0 = vmin.f32 %v598_v51, 6.0  ;;  %2201 = vmatmul.msk.f32.gmra.mxu2 %vm382_vm0, %v2661_v39 }
  0xc3   : > { %v1553_v30 = vld [vmem:[#allocation2 + $0x4a] sm:$0xff]  ;;  %v2686_v13 = vld [vmem:[#allocation2 + $0x52] sm:$0xff] }
  0xc4   : > { %v1357_v6 = vld [vmem:[#allocation2 + $0x50] sm:$0xff]  ;;  %664 = vst.msk [vmem:[#allocation2 + $0x61] sm:$0xff] %vm657_vm2, %v630_v0  ;;  %v1587_v59 = vmul.f32 %v2619_v48, %v1553_v30  ;;  %v1588_v7 = vmul.f32 %v2619_v48, %v2686_v13  ;;  %v1293_v36 = vmul.f32 %v2588_v20, %v1553_v30  ;;  %v1294_v39 = vmul.f32 %v2588_v20, %v2686_v13 }
  0xc5   : > { %v1456_v42 = vld [vmem:[#allocation2 + $0x51] sm:$0xff]  ;;  %v1392_v60 = vmul.f32 %v2594_v27, %v1357_v6  ;;  %v517_v12 = vpop.f32.mrf.mxu0  ;;  %v1098_v23 = vmul.f32 %v2564_v63, %v1357_v6  ;;  %v1000_v0 = vmul.f32 %v2571_v2, %v1553_v30  ;;  %v837_v1 = vmul.f32 %v2552_v57, %v1357_v6 }
  0xc6   : > { %v518_v16 = vadd.f32 %v2486_v25, %v517_v12  ;;  %2209 = vmatmul.msk.f32.gmra.mxu1 %vm657_vm2, %v1718_v11  ;;  %v1619_v17 = vadd.f32 %v1587_v59, %v1521_v56  ;;  %v1490_v19 = vmul.f32 %v2609_v40, %v1456_v42  ;;  %v1196_v47 = vmul.f32 %v2576_v4, %v1456_v42 }
  0xc7   : > { %v1424_v18 = vadd.f32 %v1392_v60, %v1324_v5  ;;  %v1130_v9 = vadd.f32 %v1098_v23, %v1031_v31  ;;  %v1325_v50 = vadd.f32 %v1293_v36, %v1227_v43  ;;  %v903_v5 = vmul.f32 %v2557_v58, %v1456_v42  ;;  %v550_v43 = vpop.f32.mrf.mxu2 }
  0xc8   : > { %v599_v24 = vmax.f32 %v518_v16, 0.0  ;;  %v1655_v26 = vadd.f32 %v2634_v3, %v1619_v17  ;;  %v934_v59 = vadd.f32 %v902_v54, %v836_v53  ;;  %v551_v53 = vadd.f32 %v2486_v25, %v550_v43 }
  0xc9   : > { %v1522_v28 = vadd.f32 %v1490_v19, %v1424_v18  ;;  %v1228_v52 = vadd.f32 %v1196_v47, %v1130_v9  ;;  %v935_v17 = vadd.f32 %v903_v5, %v837_v1 }
  0xca   : > { %v631_v32 = vmin.f32 %v599_v24, 6.0  ;;  %v1687_v34 = vmax.f32 %v1655_v26, 0.0  ;;  %v1032_v16 = vadd.f32 %v1000_v0, %v934_v59  ;;  %v1001_v24 = vmul.f32 %v2571_v2, %v2686_v13 }
  0xcb   : > { %v1620_v35 = vadd.f32 %v1588_v7, %v1522_v28  ;;  %v2702_v37 = vld [vmem:[#allocation2 + $0x60] sm:$0xff]  ;;  %v1326_v11 = vadd.f32 %v1294_v39, %v1228_v52  ;;  %v610_v39 = vmax.f32 %v551_v53, 0.0 }
  0xcc   : > { %665 = vst.msk [vmem:[#allocation2 + $0x69] sm:$0xff] %vm657_vm2, %v631_v32  ;;  %v1719_v38 = vmin.f32 %v1687_v34, 6.0  ;;  %v1393_v44 = vmul.f32 %v2594_v27, %v2702_v37  ;;  %v2713_v51 = vld [vmem:[#allocation2 + $0x61] sm:$0xff]  ;;  %v1099_v60 = vmul.f32 %v2564_v63, %v2702_v37  ;;  %v1033_v34 = vadd.f32 %v1001_v24, %v935_v17 }
  0xcd   : > { %v1656_v41 = vadd.f32 %v2634_v3, %v1620_v35  ;;  %v520_v45 = vpop.f32.mrf.mxu0  ;;  %v1491_v10 = vmul.f32 %v2609_v40, %v2713_v51  ;;  %v1197_v32 = vmul.f32 %v2576_v4, %v2713_v51  ;;  %v838_v0 = vmul.f32 %v2552_v57, %v2702_v37 }
  0xce   : > { %v521_v49 = vadd.f32 %v2486_v25, %v520_v45  ;;  %2210 = vmatmul.msk.f32.gmra.mxu1 %vm657_vm2, %v1719_v38  ;;  %v1425_v62 = vadd.f32 %v1393_v44, %v1325_v50  ;;  %v1131_v23 = vadd.f32 %v1099_v60, %v1032_v16  ;;  %v904_v1 = vmul.f32 %v2557_v58, %v2713_v51 }
  0xcf   : > { %v1688_v61 = vmax.f32 %v1656_v41, 0.0  ;;  %v642_v59 = vmin.f32 %v610_v39, 6.0 }
  0xd0   : > { %v600_v55 = vmax.f32 %v521_v49, 0.0  ;;  %v1523_v30 = vadd.f32 %v1491_v10, %v1425_v62  ;;  %v1229_v47 = vadd.f32 %v1197_v32, %v1131_v23  ;;  %v936_v17 = vadd.f32 %v904_v1, %v838_v0 }
  0xd1   : > { %v1720_v12 = vmin.f32 %v1688_v61, 6.0  ;;  %676 = vst.msk [vmem:[#allocation2 + $0xf1] sm:$0xff] %vm657_vm2, %v642_v59 }
  0xd2   : > { %v632_v8 = vmin.f32 %v600_v55, 6.0 }
  0xd3   : > { %v1555_v33 = vld [vmem:[#allocation2 + $0x62] sm:$0xff]  ;;  %v2731_v15 = vld [vmem:[#allocation2 + $0x6a] sm:$0xff] }
  0xd4   : > { %v1359_v56 = vld [vmem:[#allocation2 + $0x68] sm:$0xff]  ;;  %666 = vst.msk [vmem:[#allocation2 + $0x79] sm:$0xff] %vm657_vm2, %v632_v8  ;;  %v1589_v6 = vmul.f32 %v2619_v48, %v1555_v33  ;;  %v1590_v31 = vmul.f32 %v2619_v48, %v2731_v15  ;;  %v1295_v38 = vmul.f32 %v2588_v20, %v1555_v33  ;;  %v1002_v60 = vmul.f32 %v2571_v2, %v1555_v33  ;;  %v553_v33 = vpop.f32.mrf.mxu2 }
  0xd5   : > { %v1458_v46 = vld [vmem:[#allocation2 + $0x69] sm:$0xff]  ;;  %v1394_v42 = vmul.f32 %v2594_v27, %v1359_v56  ;;  %v523_v14 = vpop.f32.mrf.mxu0  ;;  %v1100_v26 = vmul.f32 %v2564_v63, %v1359_v56 }
  0xd6   : > { %v524_v18 = vadd.f32 %v2486_v25, %v523_v14  ;;  %2211 = vmatmul.msk.f32.gmra.mxu1 %vm657_vm2, %v1720_v12  ;;  %v1621_v19 = vadd.f32 %v1589_v6, %v1523_v30  ;;  %v1492_v22 = vmul.f32 %v2609_v40, %v1458_v46  ;;  %v1198_v52 = vmul.f32 %v2576_v4, %v1458_v46 }
  0xd7   : > { %v1426_v21 = vadd.f32 %v1394_v42, %v1326_v11  ;;  %v1132_v13 = vadd.f32 %v1100_v26, %v1033_v34  ;;  %v1327_v55 = vadd.f32 %v1295_v38, %v1229_v47  ;;  %v1296_v11 = vmul.f32 %v2588_v20, %v2731_v15 }
  0xd8   : > { %v601_v28 = vmax.f32 %v524_v18, 0.0  ;;  %v1657_v7 = vadd.f32 %v2634_v3, %v1621_v19  ;;  %v839_v12 = vmul.f32 %v2552_v57, %v1359_v56  ;;  %v905_v30 = vmul.f32 %v2557_v58, %v1458_v46 }
  0xd9   : > { %v1524_v29 = vadd.f32 %v1492_v22, %v1426_v21  ;;  %v1230_v62 = vadd.f32 %v1198_v52, %v1132_v13  ;;  %v1034_v24 = vadd.f32 %v1002_v60, %v936_v17  ;;  %v554_v26 = vadd.f32 %v2486_v25, %v553_v33 }
  0xda   : > { %v633_v35 = vmin.f32 %v601_v28, 6.0  ;;  %v1689_v36 = vmax.f32 %v1657_v7, 0.0  ;;  %v937_v28 = vadd.f32 %v905_v30, %v839_v12 }
  0xdb   : > { %v1622_v9 = vadd.f32 %v1590_v31, %v1524_v29  ;;  %v2745_v41 = vld [vmem:[#allocation2 + $0x78] sm:$0xff]  ;;  %v1328_v51 = vadd.f32 %v1296_v11, %v1230_v62 }
  0xdc   : > { %667 = vst.msk [vmem:[#allocation2 + $0x81] sm:$0xff] %vm657_vm2, %v633_v35  ;;  %v1721_v44 = vmin.f32 %v1689_v36, 6.0  ;;  %v1395_v49 = vmul.f32 %v2594_v27, %v2745_v41  ;;  %v2755_v61 = vld [vmem:[#allocation2 + $0x79] sm:$0xff]  ;;  %v1101_v18 = vmul.f32 %v2564_v63, %v2745_v41  ;;  %v611_v35 = vmax.f32 %v554_v26, 0.0  ;;  %v556_v62 = vpop.f32.mrf.mxu2 }
  0xdd   : > { %v1658_v45 = vadd.f32 %v2634_v3, %v1622_v9  ;;  %v526_v50 = vpop.f32.mrf.mxu0  ;;  %v1493_v37 = vmul.f32 %v2609_v40, %v2755_v61  ;;  %v1003_v36 = vmul.f32 %v2571_v2, %v2731_v15  ;;  %v557_v11 = vadd.f32 %v2486_v25, %v556_v62 }
  0xde   : > { %v527_v54 = vadd.f32 %v2486_v25, %v526_v50  ;;  %2212 = vmatmul.msk.f32.gmra.mxu1 %vm657_vm2, %v1721_v44  ;;  %v1427_v10 = vadd.f32 %v1395_v49, %v1327_v55  ;;  %v1133_v34 = vadd.f32 %v1101_v18, %v1034_v24  ;;  %v643_v47 = vmin.f32 %v611_v35, 6.0 }
  0xdf   : > { %v1690_v8 = vmax.f32 %v1658_v45, 0.0  ;;  %v1199_v45 = vmul.f32 %v2576_v4, %v2755_v61  ;;  %v1035_v49 = vadd.f32 %v1003_v36, %v937_v28 }
  0xe0   : > { %v602_v5 = vmax.f32 %v527_v54, 0.0  ;;  %v1525_v46 = vadd.f32 %v1493_v37, %v1427_v10  ;;  %677 = vst.msk [vmem:[#allocation2 + $0xf9] sm:$0xff] %vm657_vm2, %v643_v47  ;;  %v840_v37 = vmul.f32 %v2552_v57, %v2745_v41 }
  0xe1   : > { %v1722_v56 = vmin.f32 %v1690_v8, 6.0  ;;  %v1231_v1 = vadd.f32 %v1199_v45, %v1133_v34 }
  0xe2   : > { %v634_v6 = vmin.f32 %v602_v5, 6.0 }
  0xe3   : > { %v2768_v42 = vld [vmem:[#allocation2 + $0x7a] sm:$0xff]  ;;  %v2777_v23 = vld [vmem:[#allocation2 + $0x82] sm:$0xff] }
  0xe4   : > { %v1361_v14 = vld [vmem:[#allocation2 + $0x80] sm:$0xff]  ;;  %668 = vst.msk [vmem:[#allocation2 + $0x91] sm:$0xff] %vm657_vm2, %v634_v6  ;;  %v1591_v19 = vmul.f32 %v2619_v48, %v2768_v42  ;;  %v1592_v44 = vmul.f32 %v2619_v48, %v2777_v23  ;;  %v1297_v15 = vmul.f32 %v2588_v20, %v2768_v42  ;;  %v612_v6 = vmax.f32 %v557_v11, 0.0 }
  0xe5   : > { %v1460_v16 = vld [vmem:[#allocation2 + $0x81] sm:$0xff]  ;;  %v1396_v21 = vmul.f32 %v2594_v27, %v1361_v14  ;;  %v529_v22 = vpop.f32.mrf.mxu0  ;;  %v1102_v9 = vmul.f32 %v2564_v63, %v1361_v14 }
  0xe6   : > { %v530_v7 = vadd.f32 %v2486_v25, %v529_v22  ;;  %2213 = vmatmul.msk.f32.gmra.mxu1 %vm657_vm2, %v1722_v56  ;;  %v1623_v29 = vadd.f32 %v1591_v19, %v1525_v46  ;;  %v1494_v32 = vmul.f32 %v2609_v40, %v1460_v16  ;;  %v1200_v10 = vmul.f32 %v2576_v4, %v1460_v16 }
  0xe7   : > { %v1428_v31 = vadd.f32 %v1396_v21, %v1328_v51  ;;  %v1134_v55 = vadd.f32 %v1102_v9, %v1035_v49  ;;  %v1329_v60 = vadd.f32 %v1297_v15, %v1231_v1  ;;  %v906_v51 = vmul.f32 %v2557_v58, %v2755_v61 }
  0xe8   : > { %v603_v38 = vmax.f32 %v530_v7, 0.0  ;;  %v1659_v13 = vadd.f32 %v2634_v3, %v1623_v29  ;;  %v1298_v56 = vmul.f32 %v2588_v20, %v2777_v23  ;;  %v644_v46 = vmin.f32 %v612_v6, 6.0 }
  0xe9   : > { %v1526_v43 = vadd.f32 %v1494_v32, %v1428_v31  ;;  %v1232_v30 = vadd.f32 %v1200_v10, %v1134_v55  ;;  %v1004_v19 = vmul.f32 %v2571_v2, %v2768_v42  ;;  %v841_v21 = vmul.f32 %v2552_v57, %v1361_v14  ;;  %v559_v42 = vpop.f32.mrf.mxu2 }
  0xea   : > { %v635_v50 = vmin.f32 %v603_v38, 6.0  ;;  %v1691_v52 = vmax.f32 %v1659_v13, 0.0  ;;  %v907_v22 = vmul.f32 %v2557_v58, %v1460_v16  ;;  %678 = vst.msk [vmem:[#allocation2 + $0x109] sm:$0xff] %vm657_vm2, %v644_v46  ;;  %v938_v29 = vadd.f32 %v906_v51, %v840_v37 }
  0xeb   : > { %v1624_v53 = vadd.f32 %v1592_v44, %v1526_v43  ;;  %v2793_v54 = vld [vmem:[#allocation2 + $0x90] sm:$0xff]  ;;  %v1330_v61 = vadd.f32 %v1298_v56, %v1232_v30  ;;  %v560_v38 = vadd.f32 %v2486_v25, %v559_v42 }
  0xec   : > { %669 = vst.msk [vmem:[#allocation2 + $0x99] sm:$0xff] %vm657_vm2, %v635_v50  ;;  %v1723_v39 = vmin.f32 %v1691_v52, 6.0  ;;  %v1397_v5 = vmul.f32 %v2594_v27, %v2793_v54  ;;  %v2804_v12 = vld [vmem:[#allocation2 + $0x91] sm:$0xff]  ;;  %v1103_v31 = vmul.f32 %v2564_v63, %v2793_v54  ;;  %v1036_v9 = vadd.f32 %v1004_v19, %v938_v29 }
  0xed   : > { %v1660_v0 = vadd.f32 %v2634_v3, %v1624_v53  ;;  %v532_v8 = vpop.f32.mrf.mxu0  ;;  %v1495_v41 = vmul.f32 %v2609_v40, %v2804_v12  ;;  %v939_v13 = vadd.f32 %v907_v22, %v841_v21  ;;  %v613_v50 = vmax.f32 %v560_v38, 0.0 }
  0xee   : > { %v533_v59 = vadd.f32 %v2486_v25, %v532_v8  ;;  %2214 = vmatmul.msk.f32.gmra.mxu1 %vm657_vm2, %v1723_v39  ;;  %v1429_v33 = vadd.f32 %v1397_v5, %v1329_v60  ;;  %v1135_v49 = vadd.f32 %v1103_v31, %v1036_v9  ;;  %v1005_v52 = vmul.f32 %v2571_v2, %v2777_v23 }
  0xef   : > { %v1692_v18 = vmax.f32 %v1660_v0, 0.0  ;;  %v1201_v0 = vmul.f32 %v2576_v4, %v2804_v12  ;;  %v645_v1 = vmin.f32 %v613_v50, 6.0 }
  0xf0   : > { %v604_v17 = vmax.f32 %v533_v59, 0.0  ;;  %v1527_v16 = vadd.f32 %v1495_v41, %v1429_v33  ;;  %v1037_v5 = vadd.f32 %v1005_v52, %v939_v13  ;;  %v842_v41 = vmul.f32 %v2552_v57, %v2793_v54 }
  0xf1   : > { %v1724_v14 = vmin.f32 %v1692_v18, 6.0  ;;  %679 = vst.msk [vmem:[#allocation2 + $0x111] sm:$0xff] %vm657_vm2, %v645_v1  ;;  %v1233_v37 = vadd.f32 %v1201_v0, %v1135_v49 }
  0xf2   : > { %v636_v24 = vmin.f32 %v604_v17, 6.0  ;;  %v562_v17 = vpop.f32.mrf.mxu2 }
  0xf3   : > { %v2818_v26 = vld [vmem:[#allocation2 + $0x92] sm:$0xff]  ;;  %v2827_v36 = vld [vmem:[#allocation2 + $0x9a] sm:$0xff]  ;;  %v563_v56 = vadd.f32 %v2486_v25, %v562_v17 }
  0xf4   : > { %v1363_v28 = vld [vmem:[#allocation2 + $0x98] sm:$0xff]  ;;  %670 = vst.msk [vmem:[#allocation2 + $0xa9] sm:$0xff] %vm657_vm2, %v636_v24  ;;  %v1593_v32 = vmul.f32 %v2619_v48, %v2818_v26  ;;  %v1594_v39 = vmul.f32 %v2619_v48, %v2827_v36  ;;  %v1299_v23 = vmul.f32 %v2588_v20, %v2818_v26 }
  0xf5   : > { %v1462_v7 = vld [vmem:[#allocation2 + $0x99] sm:$0xff]  ;;  %v1398_v34 = vmul.f32 %v2594_v27, %v1363_v28  ;;  %v535_v35 = vpop.f32.mrf.mxu0  ;;  %v1104_v53 = vmul.f32 %v2564_v63, %v1363_v28  ;;  %v614_v24 = vmax.f32 %v563_v56, 0.0 }
  0xf6   : > { %v536_v43 = vadd.f32 %v2486_v25, %v535_v35  ;;  %2215 = vmatmul.msk.f32.gmra.mxu1 %vm657_vm2, %v1724_v14  ;;  %v1625_v44 = vadd.f32 %v1593_v32, %v1527_v16  ;;  %v1496_v47 = vmul.f32 %v2609_v40, %v1462_v7  ;;  %v1202_v33 = vmul.f32 %v2576_v4, %v1462_v7 }
  0xf7   : > { %v1430_v45 = vadd.f32 %v1398_v34, %v1330_v61  ;;  %v1136_v60 = vadd.f32 %v1104_v53, %v1037_v5  ;;  %v1331_v19 = vadd.f32 %v1299_v23, %v1233_v37  ;;  %v908_v61 = vmul.f32 %v2557_v58, %v2804_v12 }
  0xf8   : > { %v605_v15 = vmax.f32 %v536_v43, 0.0  ;;  %v1661_v55 = vadd.f32 %v2634_v3, %v1625_v44  ;;  %v1300_v14 = vmul.f32 %v2588_v20, %v2827_v36  ;;  %v646_v16 = vmin.f32 %v614_v24, 6.0 }
  0xf9   : > { %v1528_v62 = vadd.f32 %v1496_v47, %v1430_v45  ;;  %v1234_v22 = vadd.f32 %v1202_v33, %v1136_v60  ;;  %v1006_v32 = vmul.f32 %v2571_v2, %v2818_v26  ;;  %v843_v34 = vmul.f32 %v2552_v57, %v1363_v28 }
  0xfa   : > { %v637_v8 = vmin.f32 %v605_v15, 6.0  ;;  %v1693_v10 = vmax.f32 %v1661_v55, 0.0  ;;  %v909_v35 = vmul.f32 %v2557_v58, %v1462_v7  ;;  %680 = vst.msk [vmem:[#allocation2 + $0x121] sm:$0xff] %vm657_vm2, %v646_v16  ;;  %v940_v44 = vadd.f32 %v908_v61, %v842_v41  ;;  %v565_v49 = vpop.f32.mrf.mxu2 }
  0xfb   : > { %v1626_v11 = vadd.f32 %v1594_v39, %v1528_v62  ;;  %v2843_v59 = vld [vmem:[#allocation2 + $0xa8] sm:$0xff]  ;;  %v1332_v13 = vadd.f32 %v1300_v14, %v1234_v22  ;;  %v566_v15 = vadd.f32 %v2486_v25, %v565_v49 }
  0xfc   : > { %671 = vst.msk [vmem:[#allocation2 + $0xb1] sm:$0xff] %vm657_vm2, %v637_v8  ;;  %v1725_v30 = vmin.f32 %v1693_v10, 6.0  ;;  %v1399_v51 = vmul.f32 %v2594_v27, %v2843_v59  ;;  %v1463_v21 = vld [vmem:[#allocation2 + $0xa9] sm:$0xff]  ;;  %v1105_v45 = vmul.f32 %v2564_v63, %v2843_v59  ;;  %v1038_v53 = vadd.f32 %v1006_v32, %v940_v44 }
  0xfd   : > { %v1662_v6 = vadd.f32 %v2634_v3, %v1626_v11  ;;  %v538_v18 = vpop.f32.mrf.mxu0  ;;  %v1497_v54 = vmul.f32 %v2609_v40, %v1463_v21  ;;  %v941_v55 = vadd.f32 %v909_v35, %v843_v34  ;;  %v615_v8 = vmax.f32 %v566_v15, 0.0 }
  0xfe   : > { %v539_v46 = vadd.f32 %v2486_v25, %v538_v18  ;;  %2216 = vmatmul.msk.f32.gmra.mxu1 %vm657_vm2, %v1725_v30  ;;  %v1431_v42 = vadd.f32 %v1399_v51, %v1331_v19  ;;  %v1137_v5 = vadd.f32 %v1105_v45, %v1038_v53  ;;  %v1007_v10 = vmul.f32 %v2571_v2, %v2827_v36 }
  0xff   : > { %v1694_v31 = vmax.f32 %v1662_v6, 0.0  ;;  %v1203_v37 = vmul.f32 %v2576_v4, %v1463_v21  ;;  %v647_v51 = vmin.f32 %v615_v8, 6.0  ;;  %v844_v24 = vmul.f32 %v2552_v57, %v2843_v59 }
 0x100   : > { %v606_v29 = vmax.f32 %v539_v46, 0.0  ;;  %v1529_v47 = vadd.f32 %v1497_v54, %v1431_v42  ;;  %v1039_v17 = vadd.f32 %v1007_v10, %v941_v55  ;;  %v910_v41 = vmul.f32 %v2557_v58, %v1463_v21 }
 0x101   : > { %v1726_v26 = vmin.f32 %v1694_v31, 6.0  ;;  %v1235_v19 = vadd.f32 %v1203_v37, %v1137_v5  ;;  %681 = vst.msk [vmem:[#allocation2 + $0x129] sm:$0xff] %vm657_vm2, %v647_v51 }
 0x102   : > { %v638_v9 = vmin.f32 %v606_v29, 6.0  ;;  %v568_v14 = vpop.f32.mrf.mxu2  ;;  %v942_v45 = vadd.f32 %v910_v41, %v844_v24 }
 0x103   : > { %v1561_v38 = vld [vmem:[#allocation2 + $0xaa] sm:$0xff]  ;;  %v2871_v52 = vld [vmem:[#allocation2 + $0xb2] sm:$0xff]  ;;  %v569_v32 = vadd.f32 %v2486_v25, %v568_v14 }
 0x104   : > { %v1365_v12 = vld [vmem:[#allocation2 + $0xb0] sm:$0xff]  ;;  %672 = vst.msk [vmem:[#allocation2 + $0xc1] sm:$0xff] %vm657_vm2, %v638_v9  ;;  %v1595_v28 = vmul.f32 %v2619_v48, %v1561_v38  ;;  %v1596_v6 = vmul.f32 %v2619_v48, %v2871_v52  ;;  %v1301_v46 = vmul.f32 %v2588_v20, %v1561_v38  ;;  %v1008_v34 = vmul.f32 %v2571_v2, %v1561_v38 }
 0x105   : > { %v1464_v43 = vld [vmem:[#allocation2 + $0xb1] sm:$0xff]  ;;  %v1400_v7 = vmul.f32 %v2594_v27, %v1365_v12  ;;  %v541_v50 = vpop.f32.mrf.mxu0  ;;  %v1106_v11 = vmul.f32 %v2564_v63, %v1365_v12  ;;  %v845_v35 = vmul.f32 %v2552_v57, %v1365_v12  ;;  %v616_v44 = vmax.f32 %v569_v32, 0.0 }
 0x106   : > { %v542_v62 = vadd.f32 %v2486_v25, %v541_v50  ;;  %2217 = vmatmul.msk.f32.gmra.mxu1 %vm657_vm2, %v1726_v26  ;;  %v1627_v39 = vadd.f32 %v1595_v28, %v1529_v47  ;;  %v1498_v1 = vmul.f32 %v2609_v40, %v1464_v43  ;;  %v1204_v42 = vmul.f32 %v2576_v4, %v1464_v43  ;;  %v2928_v14 = vld [vmem:[#allocation2 + $0xf1] sm:$0xff] }
 0x107   : > { %v1432_v0 = vadd.f32 %v1400_v7, %v1332_v13  ;;  %v1138_v22 = vadd.f32 %v1106_v11, %v1039_v17  ;;  %v911_v59 = vmul.f32 %v2557_v58, %v1464_v43  ;;  %v1333_v9 = vadd.f32 %v1301_v46, %v1235_v19 }
 0x108   : > { %v607_v23 = vmax.f32 %v542_v62, 0.0  ;;  %v1663_v60 = vadd.f32 %v2634_v3, %v1627_v39  ;;  %v1302_v38 = vmul.f32 %v2588_v20, %v2871_v52  ;;  %v648_v12 = vmin.f32 %v616_v44, 6.0 }
 0x109   : > { %v1530_v30 = vadd.f32 %v1498_v1, %v1432_v0  ;;  %v1236_v13 = vadd.f32 %v1204_v42, %v1138_v22  ;;  %v1040_v49 = vadd.f32 %v1008_v34, %v942_v45  ;;  %v943_v43 = vadd.f32 %v911_v59, %v845_v35  ;;  %v1370_v42 = vld [vmem:[#allocation2 + $0xf0] sm:$0xff] }
 0x10a   : > { %v639_v18 = vmin.f32 %v607_v23, 6.0  ;;  %v1695_v33 = vmax.f32 %v1663_v60, 0.0  ;;  %682 = vst.msk [vmem:[#allocation2 + $0x139] sm:$0xff] %vm657_vm2, %v648_v12  ;;  %v1009_v1 = vmul.f32 %v2571_v2, %v2871_v52  ;;  %v571_v23 = vpop.f32.mrf.mxu2 }
 0x10b   : > { %v1628_v56 = vadd.f32 %v1596_v6, %v1530_v30  ;;  %v1366_v36 = vld [vmem:[#allocation2 + $0xc0] sm:$0xff]  ;;  %v1334_v15 = vadd.f32 %v1302_v38, %v1236_v13 }
 0x10c   : > { %673 = vst.msk [vmem:[#allocation2 + $0xc9] sm:$0xff] %vm657_vm2, %v639_v18  ;;  %v1727_v61 = vmin.f32 %v1695_v33, 6.0  ;;  %v1401_v31 = vmul.f32 %v2594_v27, %v1366_v36  ;;  %v1465_v54 = vld [vmem:[#allocation2 + $0xc1] sm:$0xff]  ;;  %v1107_v26 = vmul.f32 %v2564_v63, %v1366_v36  ;;  %v2915_v6 = vld [vmem:[%s3400_s2] ss:$0 sm:$0xff]  ;;  %v1041_v52 = vadd.f32 %v1009_v1, %v943_v43 }
 0x10d   : > { %v1664_v29 = vadd.f32 %v2634_v3, %v1628_v56  ;;  %v544_v16 = vpop.f32.mrf.mxu0  ;;  %v1205_v0 = vmul.f32 %v2576_v4, %v1465_v54  ;;  %v572_v37 = vadd.f32 %v2915_v6, %v571_v23  ;;  %v846_v17 = vmul.f32 %v2552_v57, %v1366_v36  ;;  %v2956_v1 = vld [vmem:[%s3401_s3] ss:$0 sm:$0xff] }
 0x10e   : > { %v545_v21 = vadd.f32 %v2486_v25, %v544_v16  ;;  %2218 = vmatmul.msk.f32.gmra.mxu1 %vm657_vm2, %v1727_v61  ;;  %v1433_v7 = vadd.f32 %v1401_v31, %v1333_v9  ;;  %v1499_v25 = vmul.f32 %v2609_v40, %v1465_v54  ;;  %v1139_v39 = vadd.f32 %v1107_v26, %v1040_v49 }
 0x10f   : > { %v1696_v28 = vmax.f32 %v1664_v29, 0.0  ;;  %v617_v24 = vmax.f32 %v572_v37, 0.0  ;;  %v912_v41 = vmul.f32 %v2557_v58, %v1465_v54  ;;  %v2936_v26 = vmul.f32 %v2552_v57, %v1370_v42 }
 0x110   : > { %v608_v47 = vmax.f32 %v545_v21, 0.0  ;;  %v1531_v8 = vadd.f32 %v1499_v25, %v1433_v7  ;;  %v1237_v19 = vadd.f32 %v1205_v0, %v1139_v39  ;;  %v2948_v25 = vld [vmem:[#allocation2 + $0xf2] sm:$0xff] }
 0x111   : > { %v1728_v5 = vmin.f32 %v1696_v28, 6.0  ;;  %v649_v16 = vmin.f32 %v617_v24, 6.0  ;;  %v944_v45 = vadd.f32 %v912_v41, %v846_v17  ;;  %v2971_v23 = vmul.f32 %v2619_v48, %v2948_v25 }
 0x112   : > { %v640_v50 = vmin.f32 %v608_v47, 6.0  ;;  %v2940_v47 = vmul.f32 %v2557_v58, %v2928_v14  ;;  %v574_v49 = vpop.f32.mrf.mxu2 }
 0x113   : > { %v1563_v53 = vld [vmem:[#allocation2 + $0xc2] sm:$0xff]  ;;  %v2910_v30 = vld [vmem:[#allocation2 + $0xca] sm:$0xff]  ;;  %683 = vst.msk [vmem:[#allocation2 + $0x141] sm:$0xff] %vm657_vm2, %v649_v16 }
 0x114   : > { %v1367_v55 = vld [vmem:[#allocation2 + $0xc8] sm:$0xff]  ;;  %674 = vst.msk [vmem:[#allocation2 + $0xd9] sm:$0xff] %vm657_vm2, %v640_v50  ;;  %v1597_v10 = vmul.f32 %v2619_v48, %v1563_v53  ;;  %v1303_v22 = vmul.f32 %v2588_v20, %v1563_v53  ;;  %v1598_v36 = vmul.f32 %v2619_v48, %v2910_v30  ;;  %v1010_v34 = vmul.f32 %v2571_v2, %v1563_v53 }
 0x115   : > { %v1466_v62 = vld [vmem:[#allocation2 + $0xc9] sm:$0xff]  ;;  %v1402_v11 = vmul.f32 %v2594_v27, %v1367_v55  ;;  %v547_v60 = vpop.f32.mrf.mxu0  ;;  %v1108_v51 = vmul.f32 %v2564_v63, %v1367_v55  ;;  %v847_v35 = vmul.f32 %v2552_v57, %v1367_v55  ;;  %v1405_v50 = vmul.f32 %v2594_v27, %v1370_v42 }
 0x116   : > { %v548_v18 = vadd.f32 %v2915_v6, %v547_v60  ;;  %2219 = vmatmul.msk.f32.gmra.mxu1 %vm657_vm2, %v1728_v5  ;;  %v1629_v33 = vadd.f32 %v1597_v10, %v1531_v8  ;;  %v1500_v46 = vmul.f32 %v2609_v40, %v1466_v62  ;;  %v913_v54 = vmul.f32 %v2557_v58, %v1466_v62  ;;  %v2962_v5 = vld [vmem:[%s3401_s3 + $0x1] ss:$0 sm:$0xff]  ;;  %v2976_v60 = vld [vmem:[%s3401_s3 + $0x2] ss:$0 sm:$0xff] }
 0x117   : > { %v1434_v56 = vadd.f32 %v1402_v11, %v1334_v15  ;;  %v1140_v32 = vadd.f32 %v1108_v51, %v1041_v52  ;;  %v1206_v44 = vmul.f32 %v2576_v4, %v1466_v62  ;;  %v1335_v7 = vadd.f32 %v1303_v22, %v1237_v19  ;;  %v2951_v62 = vld [vmem:[#allocation2 + $0xf8] sm:$0xff]  ;;  %v2998_v19 = vld [vmem:[%s3401_s3 + $0x4] ss:$0 sm:$0xff] }
 0x118   : > { %v609_v61 = vmax.f32 %v548_v18, 0.0  ;;  %v1665_v29 = vadd.f32 %v2634_v3, %v1629_v33  ;;  %v575_v4 = vadd.f32 %v2915_v6, %v574_v49  ;;  %v1042_v43 = vadd.f32 %v1010_v34, %v944_v45  ;;  %v2989_v33 = vld [vmem:[#allocation2 + $0xf9] sm:$0xff] }
 0x119   : > { %v1532_v31 = vadd.f32 %v1500_v46, %v1434_v56  ;;  %v1238_v15 = vadd.f32 %v1206_v44, %v1140_v32  ;;  %v945_v55 = vadd.f32 %v913_v54, %v847_v35  ;;  %v1304_v10 = vmul.f32 %v2588_v20, %v2910_v30  ;;  %v2984_v20 = vld [vmem:[%s3401_s3 + $0x5] ss:$0 sm:$0xff]  ;;  %v3006_v32 = vld [vmem:[%s3401_s3 + $0x8] ss:$0 sm:$0xff] }
 0x11a   : > { %v641_v59 = vmin.f32 %v609_v61, 6.0  ;;  %v1697_v21 = vmax.f32 %v1665_v29, 0.0  ;;  %v618_v39 = vmax.f32 %v575_v4, 0.0  ;;  %v1503_v11 = vmul.f32 %v2609_v40, %v2928_v14 }
 0x11b   : > { %v1630_v9 = vadd.f32 %v1598_v36, %v1532_v31  ;;  %v1368_v13 = vld [vmem:[#allocation2 + $0xd8] sm:$0xff]  ;;  %v1011_v37 = vmul.f32 %v2976_v60, %v2910_v30  ;;  %v1406_v18 = vmul.f32 %v2594_v27, %v2951_v62  ;;  %v1336_v56 = vadd.f32 %v1304_v10, %v1238_v15 }
 0x11c   : > { %675 = vst.msk [vmem:[#allocation2 + $0xe1] sm:$0xff] %vm657_vm2, %v641_v59  ;;  %v1729_v2 = vmin.f32 %v1697_v21, 6.0  ;;  %v1403_v38 = vmul.f32 %v2594_v27, %v1368_v13  ;;  %v1467_v12 = vld [vmem:[#allocation2 + $0xd9] sm:$0xff]  ;;  %v1109_v57 = vmul.f32 %v2564_v63, %v1368_v13  ;;  %v848_v63 = vmul.f32 %v2956_v1, %v1368_v13  ;;  %v3013_v59 = vld [vmem:[%s3401_s3 + $0x6] ss:$0 sm:$0xff] }
 0x11d   : > { %v1666_v28 = vadd.f32 %v2634_v3, %v1630_v9  ;;  %v914_v8 = vmul.f32 %v2962_v5, %v1467_v12  ;;  %v1501_v52 = vmul.f32 %v2609_v40, %v1467_v12  ;;  %v650_v51 = vmin.f32 %v618_v39, 6.0  ;;  %v577_v9 = vpop.f32.mrf.mxu2 }
 0x11e   : > { %2220 = vmatmul.msk.f32.gmra.mxu1 %vm657_vm2, %v1729_v2  ;;  %v1435_v53 = vadd.f32 %v1403_v38, %v1335_v7  ;;  %v1141_v0 = vadd.f32 %v1109_v57, %v1042_v43  ;;  %v1207_v17 = vmul.f32 %v2984_v20, %v1467_v12  ;;  %v1043_v46 = vadd.f32 %v1011_v37, %v945_v55 }
 0x11f   : > { %v1698_v58 = vmax.f32 %v1666_v28, 0.0  ;;  %v2993_v30 = vmul.f32 %v2609_v40, %v2989_v33  ;;  %v1111_v22 = vmul.f32 %v2998_v19, %v1370_v42  ;;  %684 = vst.msk [vmem:[#allocation2 + $0x151] sm:$0xff] %vm657_vm2, %v650_v51  ;;  %v946_v36 = vadd.f32 %v914_v8, %v848_v63 }
 0x120   : > { %v1533_v41 = vadd.f32 %v1501_v52, %v1435_v53  ;;  %v1239_v31 = vadd.f32 %v1207_v17, %v1141_v0  ;;  %v578_v13 = vadd.f32 %v2915_v6, %v577_v9  ;;  %v3035_v17 = vld [vmem:[%s3402_s4] ss:$0 sm:$0xff] }
 0x121   : > { %v1730_v24 = vmin.f32 %v1698_v58, 6.0 }
 0x122   : > { %v619_v38 = vmax.f32 %v578_v13, 0.0 }
 0x123   : > { %v1565_v61 = vld [vmem:[#allocation2 + $0xda] sm:$0xff]  ;;  %v1566_v35 = vld [vmem:[#allocation2 + $0xe2] sm:$0xff] }
 0x124   : > { %v1369_v29 = vld [vmem:[#allocation2 + $0xe0] sm:$0xff]  ;;  %v1599_v16 = vmul.f32 %v2619_v48, %v1565_v61  ;;  %v1305_v21 = vmul.f32 %v3013_v59, %v1565_v61  ;;  %v1600_v54 = vmul.f32 %v2619_v48, %v1566_v35  ;;  %v1306_v7 = vmul.f32 %v3013_v59, %v1566_v35 }
 0x125   : > { %v1468_v27 = vld [vmem:[#allocation2 + $0xe1] sm:$0xff]  ;;  %v1404_v34 = vmul.f32 %v3006_v32, %v1369_v29  ;;  %v1110_v44 = vmul.f32 %v2998_v19, %v1369_v29  ;;  %v1012_v49 = vmul.f32 %v2976_v60, %v1565_v61  ;;  %v849_v4 = vmul.f32 %v2956_v1, %v1369_v29 }
 0x126   : > { %v1502_v42 = vmul.f32 %v2609_v40, %v1468_v27  ;;  %v1208_v45 = vmul.f32 %v2984_v20, %v1468_v27  ;;  %2221 = vmatmul.msk.f32.gmra.mxu1 %vm657_vm2, %v1730_v24  ;;  %v1631_v40 = vadd.f32 %v1599_v16, %v1533_v41  ;;  %v1337_v28 = vadd.f32 %v1305_v21, %v1239_v31  ;;  %v1568_v31 = vld [vmem:[#allocation2 + $0xfa] sm:$0xff] }
 0x127   : > { %v1436_v2 = vadd.f32 %v1404_v34, %v1336_v56  ;;  %v1142_v12 = vadd.f32 %v1110_v44, %v1043_v46  ;;  %v915_v58 = vmul.f32 %v2962_v5, %v1468_v27  ;;  %v651_v53 = vmin.f32 %v619_v38, 6.0  ;;  %v580_v46 = vpop.f32.mrf.mxu2 }
 0x128   : > { %v1667_v48 = vadd.f32 %v2634_v3, %v1631_v40  ;;  %v1437_v57 = vadd.f32 %v1405_v50, %v1337_v28  ;;  %v1044_v55 = vadd.f32 %v1012_v49, %v946_v36  ;;  %v1013_v39 = vmul.f32 %v2976_v60, %v1566_v35  ;;  %v3069_v49 = vld [vmem:[%s3401_s3 + $0x9] ss:$0 sm:$0xff] }
 0x129   : > { %v1534_v43 = vadd.f32 %v1502_v42, %v1436_v2  ;;  %v1240_v15 = vadd.f32 %v1208_v45, %v1142_v12  ;;  %v947_v10 = vadd.f32 %v915_v58, %v849_v4  ;;  %685 = vst.msk [vmem:[#allocation2 + $0x159] sm:$0xff] %vm657_vm2, %v651_v53  ;;  %v1209_v3 = vmul.f32 %v2984_v20, %v2928_v14  ;;  %v1372_v14 = vld [vmem:[#allocation2 + $0x108] sm:$0xff] }
 0x12a   : > { %v1699_v0 = vmax.f32 %v1667_v48, 0.0  ;;  %v1535_v8 = vadd.f32 %v1503_v11, %v1437_v57  ;;  %v1143_v52 = vadd.f32 %v1111_v22, %v1044_v55  ;;  %v1307_v50 = vmul.f32 %v3013_v59, %v2948_v25  ;;  %v1471_v2 = vld [vmem:[#allocation2 + $0x109] sm:$0xff] }
 0x12b   : > { %v1632_v63 = vadd.f32 %v1600_v54, %v1534_v43  ;;  %v1338_v37 = vadd.f32 %v1306_v7, %v1240_v15  ;;  %v1045_v24 = vadd.f32 %v1013_v39, %v947_v10  ;;  %v581_v22 = vadd.f32 %v2915_v6, %v580_v46  ;;  %v1569_v15 = vld [vmem:[#allocation2 + $0x10a] sm:$0xff] }
 0x12c   : > { %v1731_v51 = vmin.f32 %v1699_v0, 6.0  ;;  %v1633_v11 = vadd.f32 %v2971_v23, %v1535_v8  ;;  %v1241_v61 = vadd.f32 %v1209_v3, %v1143_v52  ;;  %v1112_v29 = vmul.f32 %v2998_v19, %v2951_v62  ;;  %v3082_v8 = vld [vmem:[%s3404_s6] ss:$0 sm:$0xff] }
 0x12d   : > { %v1668_v56 = vadd.f32 %v3035_v17, %v1632_v63  ;;  %v1438_v41 = vadd.f32 %v1406_v18, %v1338_v37  ;;  %v1407_v36 = vmul.f32 %v3006_v32, %v1372_v14  ;;  %v948_v16 = vadd.f32 %v2940_v47, %v2936_v26  ;;  %v3051_v18 = vld [vmem:[%s3401_s3 + $0xa] ss:$0 sm:$0xff] }
 0x12e   : > { %2222 = vmatmul.msk.f32.gmra.mxu1 %vm657_vm2, %v1731_v51  ;;  %v1014_v23 = vmul.f32 %v2976_v60, %v2948_v25  ;;  %v1602_v34 = vmul.f32 %v3051_v18, %v1568_v31  ;;  %v620_v42 = vmax.f32 %v581_v22, 0.0  ;;  %v1144_v35 = vadd.f32 %v1112_v29, %v1045_v24  ;;  %v1966_v22 = vld [vmem:[%s2391_s10] sm:$0xff] }
 0x12f   : > { %v1700_v27 = vmax.f32 %v1668_v56, 0.0  ;;  %v1210_v21 = vmul.f32 %v2984_v20, %v2989_v33  ;;  %v1669_v54 = vadd.f32 %v3035_v17, %v1633_v11  ;;  %v1536_v26 = vadd.f32 %v2993_v30, %v1438_v41  ;;  %v3088_v11 = vld [vmem:[#allocation2 + $0x120] sm:$0xff] }
 0x130   : > { %v1339_v47 = vadd.f32 %v1307_v50, %v1241_v61  ;;  %v652_v13 = vmin.f32 %v620_v42, 6.0  ;;  %v1046_v25 = vadd.f32 %v1014_v23, %v948_v16  ;;  %v1113_v44 = vmul.f32 %v2998_v19, %v1372_v14  ;;  %v1472_v50 = vld [vmem:[#allocation2 + $0x111] sm:$0xff] }
 0x131   : > { %v1732_v9 = vmin.f32 %v1700_v27, 6.0  ;;  %v851_v45 = vmul.f32 %v2956_v1, %v2951_v62  ;;  %v917_v40 = vmul.f32 %v2962_v5, %v2989_v33  ;;  %v1242_v28 = vadd.f32 %v1210_v21, %v1144_v35  ;;  %v583_v62 = vpop.f32.mrf.mxu2  ;;  %v3073_v33 = vld [vmem:[#allocation2 + $0x110] sm:$0xff] }
 0x132   : > { %686 = vst.msk [vmem:[#allocation2 + $0x169] sm:$0xff] %vm657_vm2, %v652_v13  ;;  %v1308_v7 = vmul.f32 %v3013_v59, %v1568_v31  ;;  %v1701_v30 = vmax.f32 %v1669_v54, 0.0  ;;  %v1634_v38 = vadd.f32 %v1602_v34, %v1536_v26  ;;  %v1439_v12 = vadd.f32 %v1407_v36, %v1339_v47  ;;  %v1570_v34 = vld [vmem:[#allocation2 + $0x112] sm:$0xff] }
 0x133   : > { %2223 = vmatmul.msk.f32.vlgmr.msra.gmra.mxu3 %vm657_vm2, %v1732_v9  ;;  %v1505_v4 = vmul.f32 %v3069_v49, %v1471_v2  ;;  %v584_v48 = vadd.f32 %v2915_v6, %v583_v62  ;;  %v1145_v43 = vadd.f32 %v1113_v44, %v1046_v25  ;;  %v1211_v57 = vmul.f32 %v2984_v20, %v1471_v2  ;;  %v1473_v44 = vld [vmem:[#allocation2 + $0x121] sm:$0xff] }
 0x134   : > { %v949_v58 = vadd.f32 %v917_v40, %v851_v45  ;;  %v1015_v53 = vmul.f32 %v2976_v60, %v1568_v31  ;;  %v1340_v39 = vadd.f32 %v1308_v7, %v1242_v28  ;;  %v1408_v0 = vmul.f32 %v3006_v32, %v3073_v33 }
 0x135   : > { %v621_v55 = vmax.f32 %v584_v48, 0.0  ;;  %v1733_v63 = vmin.f32 %v1701_v30, 6.0  ;;  %v1670_v10 = vadd.f32 %v3035_v17, %v1634_v38  ;;  %v1537_v37 = vadd.f32 %v1505_v4, %v1439_v12  ;;  %v1571_v12 = vld [vmem:[#allocation2 + $0x122] sm:$0xff] }
 0x136   : > { %v1603_v52 = vmul.f32 %v3051_v18, %v1569_v15  ;;  %v1243_v51 = vadd.f32 %v1211_v57, %v1145_v43  ;;  %v1309_v56 = vmul.f32 %v3013_v59, %v1569_v15  ;;  %v1047_v46 = vadd.f32 %v1015_v53, %v949_v58  ;;  %v1967_v43 = vld [vmem:[%s2391_s10 + $0x8] sm:$0xff] }
 0x137   : > { %v653_v3 = vmin.f32 %v621_v55, 6.0  ;;  %v1114_v24 = vmul.f32 %v2998_v19, %v3073_v33  ;;  %v1440_v61 = vadd.f32 %v1408_v0, %v1340_v39  ;;  %v1506_v29 = vmul.f32 %v3069_v49, %v1472_v50  ;;  %v3119_v58 = vld [vmem:[#allocation2 + $0x128] sm:$0xff] }
 0x138   : > { %v852_v27 = vmul.f32 %v2956_v1, %v1372_v14  ;;  %v918_v31 = vmul.f32 %v2962_v5, %v1471_v2  ;;  %v1702_v16 = vmax.f32 %v1670_v10, 0.0  ;;  %v1635_v23 = vadd.f32 %v1603_v52, %v1537_v37 }
 0x139   : > { %687 = vst.msk [vmem:[#allocation2 + $0x171] sm:$0xff] %vm657_vm2, %v653_v3  ;;  %v586_v42 = vpop.f32.mrf.mxu2  ;;  %v1604_v35 = vmul.f32 %v3051_v18, %v1570_v34  ;;  %v1409_v14 = vmul.f32 %v3006_v32, %v3088_v11  ;;  %v1341_v54 = vadd.f32 %v1309_v56, %v1243_v51  ;;  %v1146_v26 = vadd.f32 %v1114_v24, %v1047_v46 }
 0x13a   : > { %v587_v21 = vadd.f32 %v2915_v6, %v586_v42  ;;  %v1212_v47 = vmul.f32 %v2984_v20, %v1472_v50  ;;  %v1538_v13 = vadd.f32 %v1506_v29, %v1440_v61  ;;  %v950_v45 = vadd.f32 %v918_v31, %v852_v27  ;;  %v3138_v42 = vld [vmem:[#allocation2 + $0x12a] sm:$0xff] }
 0x13b   : > { %2224 = vmatmul.msk.f32.gmra.mxu3 %vm657_vm2, %v1733_v63  ;;  %v1870_v41 = vpop.f32.mrf.mxu1  ;;  %v1016_v40 = vmul.f32 %v2976_v60, %v1569_v15  ;;  %v1734_v2 = vmin.f32 %v1702_v16, 6.0  ;;  %v1671_v28 = vadd.f32 %v3035_v17, %v1635_v23  ;;  %v1441_v30 = vadd.f32 %v1409_v14, %v1341_v54  ;;  %v1376_v54 = vld [vmem:[#allocation2 + $0x138] sm:$0xff] }
 0x13c   : > { %v1871_v36 = vadd.f32 %v3082_v8, %v1870_v41  ;;  %v622_v25 = vmax.f32 %v587_v21, 0.0  ;;  %v1507_v38 = vmul.f32 %v3069_v49, %v1473_v44  ;;  %v1244_v4 = vadd.f32 %v1212_v47, %v1146_v26  ;;  %v1474_v41 = vld [vmem:[#allocation2 + $0x129] sm:$0xff] }
 0x13d   : > { %v1310_v62 = vmul.f32 %v3013_v59, %v1570_v34  ;;  %v1636_v57 = vadd.f32 %v1604_v35, %v1538_v13  ;;  %v1048_v53 = vadd.f32 %v1016_v40, %v950_v45  ;;  %v1115_v15 = vmul.f32 %v2998_v19, %v3088_v11  ;;  %v1968_v21 = vld [vmem:[%s2391_s10 + $0x10] sm:$0xff] }
 0x13e   : > { %v1998_v9 = vadd.f32 %v1966_v22, %v1871_v36  ;;  %v654_v7 = vmin.f32 %v622_v25, 6.0  ;;  %v1703_v39 = vmax.f32 %v1671_v28, 0.0  ;;  %v853_v63 = vmul.f32 %v2956_v1, %v3073_v33 }
 0x13f   : > { %v919_v10 = vmul.f32 %v2962_v5, %v1472_v50  ;;  %v1605_v37 = vmul.f32 %v3051_v18, %v1571_v12  ;;  %v1539_v51 = vadd.f32 %v1507_v38, %v1441_v30  ;;  %v1342_v56 = vadd.f32 %v1310_v62, %v1244_v4  ;;  %v1475_v62 = vld [vmem:[#allocation2 + $0x139] sm:$0xff] }
 0x140   : > { %2030 = vst.msk [vmem:[%s3103_s16] sm:$0xff] %vm382_vm0, %v1998_v9  ;;  %v1410_v46 = vmul.f32 %v3006_v32, %v3119_v58  ;;  %v1147_v22 = vadd.f32 %v1115_v15, %v1048_v53  ;;  %v1213_v61 = vmul.f32 %v2984_v20, %v1473_v44  ;;  %v1735_v33 = vmin.f32 %v1703_v39, 6.0 }
 0x141   : > { %688 = vst.msk [vmem:[#allocation2 + $0x181] sm:$0xff] %vm657_vm2, %v654_v7  ;;  %v589_v0 = vpop.f32.mrf.mxu2  ;;  %v1672_v50 = vadd.f32 %v3035_v17, %v1636_v57  ;;  %v951_v29 = vadd.f32 %v919_v10, %v853_v63  ;;  %v1017_v27 = vmul.f32 %v2976_v60, %v1570_v34  ;;  %v1637_v36 = vadd.f32 %v1605_v37, %v1539_v51  ;;  %v1573_v51 = vld [vmem:[#allocation2 + $0x13a] sm:$0xff] }
 0x142   : > { %v590_v52 = vadd.f32 %v2915_v6, %v589_v0  ;;  %v1442_v16 = vadd.f32 %v1410_v46, %v1342_v56  ;;  %v1508_v23 = vmul.f32 %v3069_v49, %v1474_v41  ;;  %v1245_v14 = vadd.f32 %v1213_v61, %v1147_v22 }
 0x143   : > { %2225 = vmatmul.msk.f32.gmra.mxu3 %vm657_vm2, %v1734_v2  ;;  %v1873_v48 = vpop.f32.mrf.mxu1  ;;  %v1311_v9 = vmul.f32 %v3013_v59, %v1571_v12  ;;  %v854_v34 = vmul.f32 %v2956_v1, %v3088_v11  ;;  %v920_v26 = vmul.f32 %v2962_v5, %v1473_v44  ;;  %v1704_v13 = vmax.f32 %v1672_v50, 0.0 }
 0x144   : > { %v1874_v55 = vadd.f32 %v3082_v8, %v1873_v48  ;;  %v623_v24 = vmax.f32 %v590_v52, 0.0  ;;  %v1049_v45 = vadd.f32 %v1017_v27, %v951_v29  ;;  %v1116_v40 = vmul.f32 %v2998_v19, %v3119_v58  ;;  %v1969_v52 = vld [vmem:[%s2391_s10 + $0x18] sm:$0xff] }
 0x145   : > { %v1606_v2 = vmul.f32 %v3051_v18, %v3138_v42  ;;  %v1673_v30 = vadd.f32 %v3035_v17, %v1637_v36  ;;  %v1540_v11 = vadd.f32 %v1508_v23, %v1442_v16  ;;  %v1411_v44 = vmul.f32 %v3006_v32, %v1376_v54 }
 0x146   : > { %v1999_v3 = vadd.f32 %v1967_v43, %v1874_v55  ;;  %v655_v31 = vmin.f32 %v623_v24, 6.0  ;;  %v1343_v4 = vadd.f32 %v1311_v9, %v1245_v14  ;;  %v952_v48 = vadd.f32 %v920_v26, %v854_v34  ;;  %v1476_v9 = vld [vmem:[#allocation2 + $0x141] sm:$0xff] }
 0x147   : > { %v1018_v43 = vmul.f32 %v2976_v60, %v1571_v12  ;;  %v1736_v57 = vmin.f32 %v1704_v13, 6.0  ;;  %v1148_v53 = vadd.f32 %v1116_v40, %v1049_v45  ;;  %v1214_v15 = vmul.f32 %v2984_v20, %v1474_v41 }
 0x148   : > { %2031 = vst.msk [vmem:[%s3103_s16 + $0x8] sm:$0xff] %vm382_vm0, %v1999_v3  ;;  %v1705_v39 = vmax.f32 %v1673_v30, 0.0  ;;  %v1638_v0 = vadd.f32 %v1606_v2, %v1540_v11  ;;  %v1509_v63 = vmul.f32 %v3069_v49, %v1475_v62  ;;  %v1312_v10 = vmul.f32 %v3013_v59, %v3138_v42 }
 0x149   : > { %689 = vst.msk [vmem:[#allocation2 + $0x189] sm:$0xff] %vm657_vm2, %v655_v31  ;;  %v780_v25 = vpop.f32.mrf.mxu2  ;;  %v1443_v12 = vadd.f32 %v1411_v44, %v1343_v4  ;;  %v1050_v56 = vadd.f32 %v1018_v43, %v952_v48  ;;  %v1117_v46 = vmul.f32 %v2998_v19, %v1376_v54  ;;  %v1246_v61 = vadd.f32 %v1214_v15, %v1148_v53  ;;  %v1574_v4 = vld [vmem:[#allocation2 + $0x142] sm:$0xff]  ;;  %v1378_v43 = vld [vmem:[#allocation2 + $0x150] sm:$0xff] }
 0x14a   : > { %v781_v28 = vadd.f32 %v2915_v6, %v780_v25  ;;  %v855_v50 = vmul.f32 %v2956_v1, %v3119_v58  ;;  %v921_v29 = vmul.f32 %v2962_v5, %v1474_v41  ;;  %v1737_v36 = vmin.f32 %v1705_v39, 6.0 }
 0x14b   : > { %2226 = vmatmul.msk.f32.gmra.mxu3 %vm657_vm2, %v1735_v33  ;;  %v1876_v35 = vpop.f32.mrf.mxu1  ;;  %v1377_v33 = vld [vmem:[#allocation2 + $0x140] sm:$0xff]  ;;  %v1674_v16 = vadd.f32 %v3035_v17, %v1638_v0  ;;  %v1607_v23 = vmul.f32 %v3051_v18, %v1573_v51  ;;  %v1215_v58 = vmul.f32 %v2984_v20, %v1475_v62  ;;  %v1344_v41 = vadd.f32 %v1312_v10, %v1246_v61 }
 0x14c   : > { %v1877_v47 = vadd.f32 %v3082_v8, %v1876_v35  ;;  %v786_v38 = vmax.f32 %v781_v28, 0.0  ;;  %v1541_v35 = vadd.f32 %v1509_v63, %v1443_v12  ;;  %v1412_v14 = vmul.f32 %v3006_v32, %v1377_v33  ;;  %v1970_v28 = vld [vmem:[%s2391_s10 + $0x20] sm:$0xff]  ;;  %v1477_v63 = vld [vmem:[#allocation2 + $0x151] sm:$0xff] }
 0x14d   : > { %v1149_v34 = vadd.f32 %v1117_v46, %v1050_v56  ;;  %v953_v26 = vadd.f32 %v921_v29, %v855_v50  ;;  %v1706_v13 = vmax.f32 %v1674_v16, 0.0  ;;  %v1510_v25 = vmul.f32 %v3069_v49, %v1476_v9  ;;  %v1575_v16 = vld [vmem:[#allocation2 + $0x152] sm:$0xff] }
 0x14e   : > { %v2000_v7 = vadd.f32 %v1968_v21, %v1877_v47  ;;  %v788_v55 = vmin.f32 %v786_v38, 6.0  ;;  %v856_v45 = vmul.f32 %v2956_v1, %v1376_v54  ;;  %v922_v40 = vmul.f32 %v2962_v5, %v1475_v62 }
 0x14f   : > { %v1313_v11 = vmul.f32 %v3013_v59, %v1573_v51  ;;  %v1118_v44 = vmul.f32 %v2998_v19, %v1377_v33  ;;  %v1444_v38 = vadd.f32 %v1412_v14, %v1344_v41  ;;  %v1247_v48 = vadd.f32 %v1215_v58, %v1149_v34 }
 0x150   : > { %2032 = vst.msk [vmem:[%s3103_s16 + $0x10] sm:$0xff] %vm382_vm0, %v2000_v7  ;;  %v791_v3 = vmul.f32 0.0, %v788_v55  ;;  %v1639_v7 = vadd.f32 %v1607_v23, %v1541_v35  ;;  %v954_v62 = vadd.f32 %v922_v40, %v856_v45  ;;  %v1020_v53 = vmul.f32 %v2976_v60, %v1573_v51  ;;  %v1379_v35 = vld [vmem:[#allocation2 + $0x158] sm:$0xff] }
 0x151   : > { %v783_v22 = vpop.f32.mrf.mxu2  ;;  %v1738_v15 = vmin.f32 %v1706_v13, 6.0  ;;  %v1608_v39 = vmul.f32 %v3051_v18, %v1574_v4  ;;  %v1413_v0 = vmul.f32 %v3006_v32, %v1378_v43  ;;  %v1542_v10 = vadd.f32 %v1510_v25, %v1444_v38 }
 0x152   : > { %794 = vst.msk [vmem:[#allocation2 + $0x199] sm:$0xff] %vm657_vm2, %v791_v3  ;;  %v784_v27 = vadd.f32 %v2915_v6, %v783_v22  ;;  %v1019_v6 = vmul.f32 %v2976_v60, %v3138_v42  ;;  %v1675_v55 = vadd.f32 %v3035_v17, %v1639_v7  ;;  %v1216_v3 = vmul.f32 %v2984_v20, %v1476_v9  ;;  %v1972_v7 = vld [vmem:[%s2391_s10 + $0x30] sm:$0xff] }
 0x153   : > { %2227 = vmatmul.msk.f32.gmra.mxu3 %vm657_vm2, %v1736_v57  ;;  %v1879_v37 = vpop.f32.mrf.mxu1  ;;  %v1511_v12 = vmul.f32 %v3069_v49, %v1477_v63  ;;  %v1052_v51 = vadd.f32 %v1020_v53, %v954_v62  ;;  %v1119_v56 = vmul.f32 %v2998_v19, %v1378_v43  ;;  %v1314_v61 = vmul.f32 %v3013_v59, %v1574_v4  ;;  %v1576_v62 = vld [vmem:[#allocation2 + $0x15a] sm:$0xff] }
 0x154   : > { %v1880_v24 = vadd.f32 %v3082_v8, %v1879_v37  ;;  %v787_v21 = vmax.f32 %v784_v27, 0.0  ;;  %v1051_v57 = vadd.f32 %v1019_v6, %v953_v26  ;;  %v1345_v37 = vadd.f32 %v1313_v11, %v1247_v48 }
 0x155   : > { %v1707_v22 = vmax.f32 %v1675_v55, 0.0  ;;  %v857_v50 = vmul.f32 %v2956_v1, %v1377_v33  ;;  %v923_v29 = vmul.f32 %v2962_v5, %v1476_v9  ;;  %v1151_v14 = vadd.f32 %v1119_v56, %v1052_v51  ;;  %v1478_v33 = vld [vmem:[#allocation2 + $0x159] sm:$0xff] }
 0x156   : > { %v2001_v31 = vadd.f32 %v1969_v52, %v1880_v24  ;;  %v789_v47 = vmin.f32 %v787_v21, 6.0  ;;  %v1150_v52 = vadd.f32 %v1118_v44, %v1051_v57  ;;  %v1971_v24 = vld [vmem:[%s2391_s10 + $0x28] sm:$0xff]  ;;  %v1217_v58 = vmul.f32 %v2984_v20, %v1477_v63 }
 0x157   : > { %v1609_v41 = vmul.f32 %v3051_v18, %v1575_v16  ;;  %v1414_v34 = vmul.f32 %v3006_v32, %v1379_v35  ;;  %v955_v26 = vadd.f32 %v923_v29, %v857_v50  ;;  %v1021_v9 = vmul.f32 %v2976_v60, %v1574_v4  ;;  %v1973_v50 = vld [vmem:[%s2391_s10 + $0x38] sm:$0xff] }
 0x158   : > { %2033 = vst.msk [vmem:[%s3103_s16 + $0x18] sm:$0xff] %vm382_vm0, %v2001_v31  ;;  %v792_v30 = vmul.f32 0.0, %v789_v47  ;;  %v1640_v31 = vadd.f32 %v1608_v39, %v1542_v10  ;;  %v1248_v23 = vadd.f32 %v1216_v3, %v1150_v52  ;;  %v1739_v6 = vmin.f32 %v1707_v22, 6.0  ;;  %v1479_v39 = vld [vmem:[#allocation2 + $0x169] sm:$0xff] }
 0x159   : > { %v1512_v45 = vmul.f32 %v3069_v49, %v1478_v33  ;;  %v1249_v40 = vadd.f32 %v1217_v58, %v1151_v14  ;;  %v1053_v11 = vadd.f32 %v1021_v9, %v955_v26  ;;  %v1120_v44 = vmul.f32 %v2998_v19, %v1379_v35 }
 0x15a   : > { %795 = vst.msk [vmem:[#allocation2 + $0x1a1] sm:$0xff] %vm657_vm2, %v792_v30  ;;  %v1676_v47 = vadd.f32 %v3035_v17, %v1640_v31  ;;  %v1346_v25 = vadd.f32 %v1314_v61, %v1248_v23  ;;  %v3213_v30 = vld [vmem:[#allocation2 + $0x168] sm:$0xff]  ;;  %v924_v38 = vmul.f32 %v2962_v5, %v1477_v63  ;;  %v1218_v10 = vmul.f32 %v2984_v20, %v1478_v33 }
 0x15b   : > { %2228 = vmatmul.msk.f32.gmra.mxu3 %vm657_vm2, %v1737_v36  ;;  %v1882_v2 = vpop.f32.mrf.mxu1  ;;  %v1445_v36 = vadd.f32 %v1413_v0, %v1345_v37  ;;  %v1415_v55 = vmul.f32 %v3006_v32, %v3213_v30  ;;  %v1152_v0 = vadd.f32 %v1120_v44, %v1053_v11  ;;  %v1513_v56 = vmul.f32 %v3069_v49, %v1479_v39  ;;  %v1974_v11 = vld [vmem:[%s2391_s10 + $0x40] sm:$0xff] }
 0x15c   : > { %v1883_v42 = vadd.f32 %v3082_v8, %v1882_v2  ;;  %v1315_v2 = vmul.f32 %v3013_v59, %v1575_v16  ;;  %v1708_v48 = vmax.f32 %v1676_v47, 0.0  ;;  %v1121_v22 = vmul.f32 %v2998_v19, %v3213_v30  ;;  %v1480_v47 = vld [vmem:[#allocation2 + $0x171] sm:$0xff] }
 0x15d   : > { %v1543_v13 = vadd.f32 %v1511_v12, %v1445_v36  ;;  %v1610_v12 = vmul.f32 %v3051_v18, %v1576_v62  ;;  %v1250_v29 = vadd.f32 %v1218_v10, %v1152_v0  ;;  %v859_v36 = vmul.f32 %v2956_v1, %v1379_v35 }
 0x15e   : > { %v2002_v54 = vadd.f32 %v1970_v28, %v1883_v42  ;;  %v858_v42 = vmul.f32 %v2956_v1, %v1378_v43  ;;  %v1022_v43 = vmul.f32 %v2976_v60, %v1575_v16  ;;  %v1740_v63 = vmin.f32 %v1708_v48, 6.0 }
 0x15f   : > { %v1641_v57 = vadd.f32 %v1609_v41, %v1543_v13  ;;  %v925_v16 = vmul.f32 %v2962_v5, %v1478_v33  ;;  %v1219_v9 = vmul.f32 %v2984_v20, %v1479_v39  ;;  %v1023_v33 = vmul.f32 %v2976_v60, %v1576_v62 }
 0x160   : > { %2034 = vst.msk [vmem:[%s3103_s16 + $0x20] sm:$0xff] %vm382_vm0, %v2002_v54  ;;  %v1446_v54 = vadd.f32 %v1414_v34, %v1346_v25  ;;  %v956_v37 = vadd.f32 %v924_v38, %v858_v42  ;;  %v1578_v42 = vld [vmem:[#allocation2 + $0x172] sm:$0xff] }
 0x161   : > { %v1677_v52 = vadd.f32 %v3035_v17, %v1641_v57  ;;  %v957_v35 = vadd.f32 %v925_v16, %v859_v36  ;;  %v1612_v10 = vmul.f32 %v3051_v18, %v1578_v42  ;;  %v1579_v36 = vld [vmem:[#allocation2 + $0x182] sm:$0xff] }
 0x162   : > { %v1544_v3 = vadd.f32 %v1512_v45, %v1446_v54  ;;  %v1054_v31 = vadd.f32 %v1022_v43, %v956_v37 }
 0x163   : > { %2229 = vmatmul.msk.f32.gmra.mxu3 %vm657_vm2, %v1738_v15  ;;  %v1885_v46 = vpop.f32.mrf.mxu1  ;;  %v1347_v15 = vadd.f32 %v1315_v2, %v1249_v40  ;;  %v1514_v2 = vmul.f32 %v3069_v49, %v1480_v47  ;;  %v1055_v48 = vadd.f32 %v1023_v33, %v957_v35  ;;  %v1482_v33 = vld [vmem:[#allocation2 + $0x189] sm:$0xff] }
 0x164   : > { %v1886_v27 = vadd.f32 %v3082_v8, %v1885_v46  ;;  %v1577_v46 = vld [vmem:[#allocation2 + $0x16a] sm:$0xff]  ;;  %v1642_v14 = vadd.f32 %v1610_v12, %v1544_v3  ;;  %v1153_v13 = vadd.f32 %v1121_v22, %v1054_v31  ;;  %v1220_v12 = vmul.f32 %v2984_v20, %v1480_v47 }
 0x165   : > { %v1447_v51 = vadd.f32 %v1415_v55, %v1347_v15  ;;  %v1611_v58 = vmul.f32 %v3051_v18, %v1577_v46  ;;  %v926_v15 = vmul.f32 %v2962_v5, %v1479_v39  ;;  %v1024_v39 = vmul.f32 %v2976_v60, %v1577_v46 }
 0x166   : > { %v2003_v21 = vadd.f32 %v1971_v24, %v1886_v27  ;;  %v1316_v24 = vmul.f32 %v3013_v59, %v1576_v62  ;;  %v3233_v27 = vld [vmem:[#allocation2 + $0x170] sm:$0xff]  ;;  %v1678_v45 = vadd.f32 %v3035_v17, %v1642_v14  ;;  %v1251_v38 = vadd.f32 %v1219_v9, %v1153_v13 }
 0x167   : > { %v1545_v34 = vadd.f32 %v1513_v56, %v1447_v51  ;;  %v1416_v26 = vmul.f32 %v3006_v32, %v3233_v27  ;;  %v1122_v57 = vmul.f32 %v2998_v19, %v3233_v27  ;;  %v1318_v22 = vmul.f32 %v3013_v59, %v1578_v42 }
 0x168   : > { %2035 = vst.msk [vmem:[%s3103_s16 + $0x28] sm:$0xff] %vm382_vm0, %v2003_v21  ;;  %v1709_v21 = vmax.f32 %v1677_v52, 0.0  ;;  %v1710_v62 = vmax.f32 %v1678_v45, 0.0  ;;  %v1481_v52 = vld [vmem:[#allocation2 + $0x181] sm:$0xff] }
 0x169   : > { %v1643_v40 = vadd.f32 %v1611_v58, %v1545_v34  ;;  %v1154_v3 = vadd.f32 %v1122_v57, %v1055_v48  ;;  %v861_v58 = vmul.f32 %v2956_v1, %v3233_v27  ;;  %v1516_v27 = vmul.f32 %v3069_v49, %v1482_v33  ;;  %v1580_v48 = vld [vmem:[#allocation2 + $0x18a] sm:$0xff] }
 0x16a   : > { %v1741_v25 = vmin.f32 %v1709_v21, 6.0  ;;  %v1742_v51 = vmin.f32 %v1710_v62, 6.0 }
 0x16b   : > { %2230 = vmatmul.msk.f32.gmra.mxu3 %vm657_vm2, %v1739_v6  ;;  %v1888_v28 = vpop.f32.mrf.mxu1  ;;  %v1348_v6 = vadd.f32 %v1316_v24, %v1250_v29  ;;  %v1679_v0 = vadd.f32 %v3035_v17, %v1643_v40  ;;  %v1515_v24 = vmul.f32 %v3069_v49, %v1481_v52  ;;  %v1252_v16 = vadd.f32 %v1220_v12, %v1154_v3 }
 0x16c   : > { %v1889_v4 = vadd.f32 %v3082_v8, %v1888_v28  ;;  %v1317_v28 = vmul.f32 %v3013_v59, %v1577_v46 }
 0x16d   : > { %v1448_v44 = vadd.f32 %v1416_v26, %v1348_v6  ;;  %v1711_v56 = vmax.f32 %v1679_v0, 0.0  ;;  %v1613_v26 = vmul.f32 %v3051_v18, %v1579_v36  ;;  %v1350_v45 = vadd.f32 %v1318_v22, %v1252_v16 }
 0x16e   : > { %v2004_v53 = vadd.f32 %v1972_v7, %v1889_v4  ;;  %v1382_v4 = vld [vmem:[#allocation2 + $0x180] sm:$0xff] }
 0x16f   : > { %v1417_v37 = vmul.f32 %v3006_v32, %v1382_v4  ;;  %v1546_v43 = vadd.f32 %v1514_v2, %v1448_v44  ;;  %v1123_v21 = vmul.f32 %v2998_v19, %v1382_v4  ;;  %v1743_v6 = vmin.f32 %v1711_v56, 6.0  ;;  %v1976_v2 = vld [vmem:[%s2391_s10 + $0x50] sm:$0xff] }
 0x170   : > { %2036 = vst.msk [vmem:[%s3103_s16 + $0x30] sm:$0xff] %vm382_vm0, %v2004_v53  ;;  %v860_v53 = vmul.f32 %v2956_v1, %v3213_v30 }
 0x171   : > { %v1644_v29 = vadd.f32 %v1612_v10, %v1546_v43  ;;  %v1483_v10 = vld [vmem:[#allocation2 + $0x199] sm:$0xff]  ;;  %v1222_v43 = vmul.f32 %v2984_v20, %v1482_v33 }
 0x172   : > { %v958_v30 = vadd.f32 %v926_v15, %v860_v53  ;;  %v1614_v15 = vmul.f32 %v3051_v18, %v1580_v48  ;;  %v1517_v12 = vmul.f32 %v3069_v49, %v1483_v10 }
 0x173   : > { %2231 = vmatmul.msk.f32.gmra.mxu3 %vm657_vm2, %v1740_v63  ;;  %v1891_v61 = vpop.f32.mrf.mxu1  ;;  %v1349_v63 = vadd.f32 %v1317_v28, %v1251_v38  ;;  %v1680_v13 = vadd.f32 %v3035_v17, %v1644_v29 }
 0x174   : > { %v1892_v23 = vadd.f32 %v3082_v8, %v1891_v61  ;;  %v1056_v46 = vadd.f32 %v1024_v39, %v958_v30 }
 0x175   : > { %v1449_v31 = vadd.f32 %v1417_v37, %v1349_v63  ;;  %v1712_v28 = vmax.f32 %v1680_v13, 0.0 }
 0x176   : > { %v2005_v41 = vadd.f32 %v1973_v50, %v1892_v23  ;;  %v1975_v50 = vld [vmem:[%s2391_s10 + $0x48] sm:$0xff]  ;;  %v1155_v40 = vadd.f32 %v1123_v21, %v1056_v46 }
 0x177   : > { %v1383_v23 = vld [vmem:[#allocation2 + $0x188] sm:$0xff]  ;;  %v1547_v35 = vadd.f32 %v1515_v24, %v1449_v31  ;;  %v1744_v62 = vmin.f32 %v1712_v28, 6.0  ;;  %v1581_v24 = vld [vmem:[#allocation2 + $0x19a] sm:$0xff] }
 0x178   : > { %2037 = vst.msk [vmem:[%s3103_s16 + $0x38] sm:$0xff] %vm382_vm0, %v2005_v41  ;;  %v927_v41 = vmul.f32 %v2962_v5, %v1480_v47  ;;  %v1418_v9 = vmul.f32 %v3006_v32, %v1383_v23  ;;  %v1025_v5 = vmul.f32 %v2976_v60, %v1578_v42  ;;  %v1124_v44 = vmul.f32 %v2998_v19, %v1383_v23  ;;  %v1384_v60 = vld [vmem:[#allocation2 + $0x198] sm:$0xff]  ;;  %v1484_v23 = vld [vmem:[#allocation2 + $0x1a1] sm:$0xff] }
 0x179   : > { %v1518_v46 = vmul.f32 %v3069_v49, %v1484_v23 }
 0x17a   : > { %v959_v1 = vadd.f32 %v927_v41, %v861_v58  ;;  %v1450_v4 = vadd.f32 %v1418_v9, %v1350_v45 }
 0x17b   : > { %2232 = vmatmul.msk.f32.gmra.mxu3 %vm657_vm2, %v1741_v25  ;;  %v1894_v7 = vpop.f32.mrf.mxu1  ;;  %v1221_v25 = vmul.f32 %v2984_v20, %v1481_v52  ;;  %v1977_v52 = vld [vmem:[%s2391_s10 + $0x58] sm:$0xff]  ;;  %v1615_v20 = vmul.f32 %v3051_v18, %v1581_v24  ;;  %v1987_v24 = vld [vmem:[%s2391_s10 + $0xa8] sm:$0xff] }
 0x17c   : > { %v1895_v54 = vadd.f32 %v3082_v8, %v1894_v7  ;;  %v1645_v7 = vadd.f32 %v1613_v26, %v1547_v35  ;;  %v1057_v42 = vadd.f32 %v1025_v5, %v959_v1  ;;  %v1548_v0 = vadd.f32 %v1516_v27, %v1450_v4  ;;  %v1582_v26 = vld [vmem:[#allocation2 + $0x1a2] sm:$0xff] }
 0x17d   : > { %v1253_v57 = vadd.f32 %v1221_v25, %v1155_v40  ;;  %v1616_v33 = vmul.f32 %v3051_v18, %v1582_v26  ;;  %v1979_v25 = vld [vmem:[%s2391_s10 + $0x68] sm:$0xff] }
 0x17e   : > { %v2006_v55 = vadd.f32 %v1974_v11, %v1895_v54  ;;  %v1319_v11 = vmul.f32 %v3013_v59, %v1579_v36  ;;  %v1681_v53 = vadd.f32 %v3035_v17, %v1645_v7  ;;  %v1156_v37 = vadd.f32 %v1124_v44, %v1057_v42 }
 0x17f   : > { %v1646_v39 = vadd.f32 %v1614_v15, %v1548_v0 }
 0x180   : > { %2038 = vst.msk [vmem:[%s3103_s16 + $0x40] sm:$0xff] %vm382_vm0, %v2006_v55  ;;  %v1419_v55 = vmul.f32 %v3006_v32, %v1384_v60  ;;  %v1351_v19 = vadd.f32 %v1319_v11, %v1253_v57  ;;  %v1713_v3 = vmax.f32 %v1681_v53, 0.0  ;;  %v1254_v22 = vadd.f32 %v1222_v43, %v1156_v37  ;;  %v1982_v60 = vld [vmem:[%s2391_s10 + $0x80] sm:$0xff]  ;;  %v1983_v53 = vld [vmem:[%s2391_s10 + $0x88] sm:$0xff] }
 0x181   : > { %v1682_v36 = vadd.f32 %v3035_v17, %v1646_v39 }
 0x182   : > { %v1451_v56 = vadd.f32 %v1419_v55, %v1351_v19  ;;  %v1745_v31 = vmin.f32 %v1713_v3, 6.0  ;;  %v1984_v19 = vld [vmem:[%s2391_s10 + $0x90] sm:$0xff] }
 0x183   : > { %2233 = vmatmul.msk.f32.gmra.mxu3 %vm657_vm2, %v1742_v51  ;;  %v1897_v61 = vpop.f32.mrf.mxu1  ;;  %v1320_v51 = vmul.f32 %v3013_v59, %v1580_v48  ;;  %v1714_v41 = vmax.f32 %v1682_v36, 0.0 }
 0x184   : > { %v1898_v14 = vadd.f32 %v3082_v8, %v1897_v61  ;;  %v1385_v61 = vld [vmem:[#allocation2 + $0x1a0] sm:$0xff]  ;;  %v1549_v59 = vadd.f32 %v1517_v12, %v1451_v56 }
 0x185   : > { %v1420_v29 = vmul.f32 %v3006_v32, %v1385_v61  ;;  %v1352_v16 = vadd.f32 %v1320_v51, %v1254_v22  ;;  %v1986_v51 = vld [vmem:[%s2391_s10 + $0xa0] sm:$0xff] }
 0x186   : > { %v2007_v34 = vadd.f32 %v1975_v50, %v1898_v14  ;;  %v1978_v14 = vld [vmem:[%s2391_s10 + $0x60] sm:$0xff]  ;;  %v1647_v32 = vadd.f32 %v1615_v20, %v1549_v59  ;;  %v1988_v20 = vld [vmem:[%s2391_s10 + $0xb0] sm:$0xff]  ;;  %v1989_v59 = vld [vmem:[%s2391_s10 + $0xb8] sm:$0xff] }
 0x188   : > { %2039 = vst.msk [vmem:[%s3103_s16 + $0x48] sm:$0xff] %vm382_vm0, %v2007_v34  ;;  %v1452_v34 = vadd.f32 %v1420_v29, %v1352_v16  ;;  %v1683_v13 = vadd.f32 %v3035_v17, %v1647_v32  ;;  %v1991_v32 = vld [vmem:[%s2391_s10 + $0xc8] sm:$0xff] }
 0x18a   : > { %v1550_v35 = vadd.f32 %v1518_v46, %v1452_v34  ;;  %v1715_v40 = vmax.f32 %v1683_v13, 0.0 }
 0x18b   : > { %2234 = vmatmul.msk.f32.gmra.mxu3 %vm657_vm2, %v1743_v6  ;;  %v1900_v47 = vpop.f32.mrf.mxu1  ;;  %v1746_v6 = vmin.f32 %v1714_v41, 6.0 }
 0x18c   : > { %v1901_v38 = vadd.f32 %v3082_v8, %v1900_v47  ;;  %v1648_v1 = vadd.f32 %v1616_v33, %v1550_v35  ;;  %v1747_v27 = vmin.f32 %v1715_v40, 6.0 }
 0x18e   : > { %v2008_v54 = vadd.f32 %v1976_v2, %v1901_v38  ;;  %v1684_v47 = vadd.f32 %v3035_v17, %v1648_v1  ;;  %v1980_v2 = vld [vmem:[%s2391_s10 + $0x70] sm:$0xff]  ;;  %v1981_v17 = vld [vmem:[%s2391_s10 + $0x78] sm:$0xff]  ;;  %v1994_v1 = vld [vmem:[%s2391_s10 + $0xe0] sm:$0xff] }
 0x190   : > { %2040 = vst.msk [vmem:[%s3103_s16 + $0x50] sm:$0xff] %vm382_vm0, %v2008_v54  ;;  %v1716_v7 = vmax.f32 %v1684_v47, 0.0 }
 0x192   : > { %v1748_v44 = vmin.f32 %v1716_v7, 6.0 }
 0x193   : > { %2235 = vmatmul.msk.f32.gmra.mxu3 %vm657_vm2, %v1744_v62  ;;  %v1903_v63 = vpop.f32.mrf.mxu1 }
 0x194   : > { %v1904_v30 = vadd.f32 %v3082_v8, %v1903_v63  ;;  %v1985_v63 = vld [vmem:[%s2391_s10 + $0x98] sm:$0xff] }
 0x196   : > { %v2009_v50 = vadd.f32 %v1977_v52, %v1904_v30 }
 0x198   : > { %2041 = vst.msk [vmem:[%s3103_s16 + $0x58] sm:$0xff] %vm382_vm0, %v2009_v50 }
 0x19b   : > { %2236 = vmatmul.msk.f32.gmra.mxu3 %vm657_vm2, %v1745_v31  ;;  %v1906_v21 = vpop.f32.mrf.mxu1 }
 0x19c   : > { %v1907_v58 = vadd.f32 %v3082_v8, %v1906_v21 }
 0x19e   : > { %v2010_v9 = vadd.f32 %v1978_v14, %v1907_v58  ;;  %v1990_v14 = vld [vmem:[%s2391_s10 + $0xc0] sm:$0xff] }
 0x1a0   : > { %2042 = vst.msk [vmem:[%s3103_s16 + $0x60] sm:$0xff] %vm382_vm0, %v2010_v9 }
 0x1a3   : > { %2237 = vmatmul.msk.f32.gmra.mxu3 %vm657_vm2, %v1746_v6  ;;  %v1909_v49 = vpop.f32.mrf.mxu1  ;;  %v1992_v6 = vld [vmem:[%s2391_s10 + $0xd0] sm:$0xff] }
 0x1a4   : > { %v1910_v45 = vadd.f32 %v3082_v8, %v1909_v49  ;;  %v1993_v49 = vld [vmem:[%s2391_s10 + $0xd8] sm:$0xff] }
 0x1a6   : > { %v2011_v5 = vadd.f32 %v1979_v25, %v1910_v45 }
 0x1a8   : > { %2043 = vst.msk [vmem:[%s3103_s16 + $0x68] sm:$0xff] %vm382_vm0, %v2011_v5 }
 0x1ab   : > { %2238 = vmatmul.msk.f32.gmra.mxu3 %vm657_vm2, %v1747_v27  ;;  %v1912_v18 = vpop.f32.mrf.mxu1 }
 0x1ac   : > { %v1913_v28 = vadd.f32 %v3082_v8, %v1912_v18  ;;  %v1995_v18 = vld [vmem:[%s2391_s10 + $0xe8] sm:$0xff] }
 0x1ae   : > { %v2012_v11 = vadd.f32 %v1980_v2, %v1913_v28 }
 0x1b0   : > { %2044 = vst.msk [vmem:[%s3103_s16 + $0x70] sm:$0xff] %vm382_vm0, %v2012_v11  ;;  %v1996_v11 = vld [vmem:[%s2391_s10 + $0xf0] sm:$0xff] }
 0x1b3   : > { %2239 = vmatmul.msk.f32.gmra.mxu3 %vm657_vm2, %v1748_v44 }
 0x1b6   : > { %v1915_v38 = vpop.f32.mrf.mxu3 }
 0x1b7   : > { %v1916_v4 = vadd.f32 %v3082_v8, %v1915_v38 }
 0x1b9   : > { %v2013_v48 = vadd.f32 %v1981_v17, %v1916_v4  ;;  %v1997_v4 = vld [vmem:[%s2391_s10 + $0xf8] sm:$0xff] }
 0x1bb   : > { %2045 = vst.msk [vmem:[%s3103_s16 + $0x78] sm:$0xff] %vm382_vm0, %v2013_v48 }
 0x1be   : > { %v1918_v57 = vpop.f32.mrf.mxu3 }
 0x1bf   : > { %v1919_v42 = vadd.f32 %v3082_v8, %v1918_v57 }
 0x1c1   : > { %v2014_v54 = vadd.f32 %v1982_v60, %v1919_v42 }
 0x1c3   : > { %2046 = vst.msk [vmem:[%s3103_s16 + $0x80] sm:$0xff] %vm382_vm0, %v2014_v54 }
 0x1c6   : > { %v1921_v62 = vpop.f32.mrf.mxu3 }
 0x1c7   : > { %v1922_v15 = vadd.f32 %v3082_v8, %v1921_v62 }
 0x1c9   : > { %v2015_v55 = vadd.f32 %v1983_v53, %v1922_v15 }
 0x1cb   : > { %2047 = vst.msk [vmem:[%s3103_s16 + $0x88] sm:$0xff] %vm382_vm0, %v2015_v55 }
 0x1ce   : > { %v1924_v0 = vpop.f32.mrf.mxu3 }
 0x1cf   : > { %v1925_v10 = vadd.f32 %v3082_v8, %v1924_v0 }
 0x1d1   : > { %v2016_v37 = vadd.f32 %v1984_v19, %v1925_v10 }
 0x1d3   : > { %2048 = vst.msk [vmem:[%s3103_s16 + $0x90] sm:$0xff] %vm382_vm0, %v2016_v37 }
 0x1d6   : > { %v1927_v43 = vpop.f32.mrf.mxu3 }
 0x1d7   : > { %v1928_v52 = vadd.f32 %v3082_v8, %v1927_v43 }
 0x1d9   : > { %v2017_v3 = vadd.f32 %v1985_v63, %v1928_v52 }
 0x1db   : > { %2049 = vst.msk [vmem:[%s3103_s16 + $0x98] sm:$0xff] %vm382_vm0, %v2017_v3 }
 0x1de   : > { %v1930_v12 = vpop.f32.mrf.mxu3 }
 0x1df   : > { %v1931_v30 = vadd.f32 %v3082_v8, %v1930_v12 }
 0x1e1   : > { %v2018_v39 = vadd.f32 %v1986_v51, %v1931_v30 }
 0x1e3   : > { %2050 = vst.msk [vmem:[%s3103_s16 + $0xa0] sm:$0xff] %vm382_vm0, %v2018_v39 }
 0x1e6   : > { %v1933_v56 = vpop.f32.mrf.mxu3 }
 0x1e7   : > { %v1934_v22 = vadd.f32 %v3082_v8, %v1933_v56 }
 0x1e9   : > { %v2019_v61 = vadd.f32 %v1987_v24, %v1934_v22 }
 0x1eb   : > { %2051 = vst.msk [vmem:[%s3103_s16 + $0xa8] sm:$0xff] %vm382_vm0, %v2019_v61 }
 0x1ee   : > { %v1936_v50 = vpop.f32.mrf.mxu3 }
 0x1ef   : > { %v1937_v29 = vadd.f32 %v3082_v8, %v1936_v50 }
 0x1f1   : > { %v2020_v31 = vadd.f32 %v1988_v20, %v1937_v29 }
 0x1f3   : > { %2052 = vst.msk [vmem:[%s3103_s16 + $0xb0] sm:$0xff] %vm382_vm0, %v2020_v31 }
 0x1f6   : > { %v1939_v36 = vpop.f32.mrf.mxu3 }
 0x1f7   : > { %v1940_v16 = vadd.f32 %v3082_v8, %v1939_v36 }
 0x1f9   : > { %v2021_v23 = vadd.f32 %v1989_v59, %v1940_v16 }
 0x1fb   : > { %2053 = vst.msk [vmem:[%s3103_s16 + $0xb8] sm:$0xff] %vm382_vm0, %v2021_v23 }
 0x1fe   : > { %v1942_v21 = vpop.f32.mrf.mxu3 }
 0x1ff   : > { %v1943_v46 = vadd.f32 %v3082_v8, %v1942_v21 }
 0x201   : > { %v2022_v58 = vadd.f32 %v1990_v14, %v1943_v46 }
 0x203   : > { %2054 = vst.msk [vmem:[%s3103_s16 + $0xc0] sm:$0xff] %vm382_vm0, %v2022_v58 }
 0x206   : > { %v1945_v41 = vpop.f32.mrf.mxu3 }
 0x207   : > { %v1946_v34 = vadd.f32 %v3082_v8, %v1945_v41 }
 0x209   : > { %v2023_v26 = vadd.f32 %v1991_v32, %v1946_v34 }
 0x20b   : > { %2055 = vst.msk [vmem:[%s3103_s16 + $0xc8] sm:$0xff] %vm382_vm0, %v2023_v26 }
 0x20e   : > { %v1948_v9 = vpop.f32.mrf.mxu3 }
 0x20f   : > { %v1949_v13 = vadd.f32 %v3082_v8, %v1948_v9 }
 0x211   : > { %v2024_v35 = vadd.f32 %v1992_v6, %v1949_v13 }
 0x213   : > { %2056 = vst.msk [vmem:[%s3103_s16 + $0xd0] sm:$0xff] %vm382_vm0, %v2024_v35 }
 0x216   : > { %v1951_v33 = vpop.f32.mrf.mxu3 }
 0x217   : > { %v1952_v25 = vadd.f32 %v3082_v8, %v1951_v33 }
 0x219   : > { %v2025_v45 = vadd.f32 %v1993_v49, %v1952_v25 }
 0x21b   : > { %2057 = vst.msk [vmem:[%s3103_s16 + $0xd8] sm:$0xff] %vm382_vm0, %v2025_v45 }
 0x21e   : > { %v1954_v40 = vpop.f32.mrf.mxu3 }
 0x21f   : > { %v1955_v5 = vadd.f32 %v3082_v8, %v1954_v40 }
 0x221   : > { %v2026_v27 = vadd.f32 %v1994_v1, %v1955_v5 }
 0x223   : > { %2058 = vst.msk [vmem:[%s3103_s16 + $0xe0] sm:$0xff] %vm382_vm0, %v2026_v27 }
 0x226   : > { %v1957_v47 = vpop.f32.mrf.mxu3 }
 0x227   : > { %v1958_v2 = vadd.f32 %v3082_v8, %v1957_v47 }
 0x229   : > { %v2027_v28 = vadd.f32 %v1995_v18, %v1958_v2 }
 0x22b   : > { %2059 = vst.msk [vmem:[%s3103_s16 + $0xe8] sm:$0xff] %vm382_vm0, %v2027_v28 }
 0x22e   : > { %v1960_v7 = vpop.f32.mrf.mxu3 }
 0x22f   : > { %v1961_v44 = vadd.f32 %v3082_v8, %v1960_v7 }
 0x231   : > { %v2028_v38 = vadd.f32 %v1996_v11, %v1961_v44 }
 0x233   : > { %2060 = vst.msk [vmem:[%s3103_s16 + $0xf0] sm:$0xff] %vm382_vm0, %v2028_v38 }
 0x236   : > { %v1963_v17 = vpop.f32.mrf.mxu3 }
 0x237   : > { %v1964_v48 = vadd.f32 %v3082_v8, %v1963_v17 }
 0x239   : > { %v2029_v57 = vadd.f32 %v1997_v4, %v1964_v48 }
 0x23b   : > { %2061 = vst.msk [vmem:[%s3103_s16 + $0xf8] sm:$0xff] %vm382_vm0, %v2029_v57 }
 0x23c PF: > { %s17_s26 = sadd.s32 1, %s2319_s26   ;;  %s3406_s24 = smov %s2315_s25 }
 0x23d   : > { %p14_p5 = scmp.ge.s32.totalorder %s17_s26, 4   ;;  %s3407_s25 = smov %s3409_s27 }
 0x23f   :  { %16 = sbr.rel (!%p14_p5) target bundleno = 2 (0x2), region = 86 }

</bundles_post_ra>
